<compile_context>
chip_gen: v6e
topology: v6e:2x2x1
jax: 0.10.0
libtpu: 0.0.40
codegen_flags: <defaults>
</compile_context>

<pallas_src>
import functools

import jax
import jax.numpy as jnp
from jax.experimental import pallas as pl
from jax.experimental.pallas import tpu as pltpu


# ---------------------------------------------------------------------------
# Kernels
# ---------------------------------------------------------------------------

def _fused_disc_kernel(*refs, n_hidden):
    """Fused forward for the whole discriminator.

    refs = (x_ref,
            w0_ref, b0_ref, ..., w{n_hidden-1}_ref, b{n_hidden-1}_ref,
            wf_ref, bf_ref,
            feat_ref, out_ref)
    Weights are pre-folded ([In, Out], possibly bf16); biases are [1, Out] f32.
    """
    x_ref = refs[0]
    layer_refs = refs[1:1 + 2 * (n_hidden + 1)]
    feat_ref, out_ref = refs[1 + 2 * (n_hidden + 1):]

    h = x_ref[...].astype(jnp.float32)

    for i in range(n_hidden):
        w_ref = layer_refs[2 * i]
        b_ref = layer_refs[2 * i + 1]
        # MXU matmul: cast activations to the (bf16) weight dtype, accumulate f32.
        y = jnp.dot(h.astype(w_ref.dtype), w_ref[...],
                    preferred_element_type=jnp.float32) + b_ref[...]
        # ELU (alpha=1), elementwise math in f32.
        # TODO(synk): use jnp.expm1 for better small-|y| accuracy once its Mosaic
        # lowering is guaranteed on all target generations.
        h = jnp.where(y > 0, y, jnp.exp(y) - 1.0)

    # Features after the last ELU (x_f in the PyTorch module).
    feat_ref[...] = h.astype(feat_ref.dtype)

    wf_ref = layer_refs[2 * n_hidden]
    bf_ref = layer_refs[2 * n_hidden + 1]
    yf = jnp.dot(h.astype(wf_ref.dtype), wf_ref[...],
                 preferred_element_type=jnp.float32) + bf_ref[...]
    # Sigmoid; 1/(1+exp(-y)) saturates correctly to 0 for very negative y in f32.
    out_ref[...] = (1.0 / (1.0 + jnp.exp(-yf))).astype(out_ref.dtype)


def _single_layer_kernel(x_ref, w_ref, b_ref, o_ref):
    """First-layer-only path (`first=True` in the PyTorch forward): no activation."""
    y = jnp.dot(x_ref[...].astype(w_ref.dtype), w_ref[...],
                preferred_element_type=jnp.float32) + b_ref[...]
    o_ref[...] = y.astype(o_ref.dtype)


# ---------------------------------------------------------------------------
# Parameter preparation (done once, outside the kernel: weights are static)
# ---------------------------------------------------------------------------

def _fold_weight_norm(w, scale, b, weight_dtype):
    """Fold the weight-norm into the weight and pre-transpose to [In, Out].

    w: [Out, In] (PyTorch convention), scale: [Out, 1], b: [Out]
    returns (w_folded_T [In, Out] in weight_dtype, bias [1, Out] f32)
    """
    w32 = w.astype(jnp.float32)
    norm_sq = jnp.sum(w32 * w32, axis=1, keepdims=True)          # [Out, 1]
    # tiny eps guards against an all-zero row producing NaN; negligible otherwise.
    w_n = w32 * (scale.astype(jnp.float32) * jax.lax.rsqrt(norm_sq + 1e-20))
    return w_n.T.astype(weight_dtype), b.reshape(1, -1).astype(jnp.float32)


def prepare_params(hidden_params, final_params, weight_dtype=jnp.bfloat16):
    """Fold + transpose every layer; returns a list of 6 (w_t, b) pairs."""
    layers = [_fold_weight_norm(w, s, b, weight_dtype) for (w, s, b) in hidden_params]
    wf, sf, bf = final_params
    layers.append(_fold_weight_norm(wf, sf, bf, weight_dtype))
    return layers


def init_discriminator_params(key, input_dim, output_dim=1):
    """Deterministic synthetic init matching LinearWeightNorm's shapes.

    weight ~ N(0, 1) * 0.1 (weight_init_stdv), bias = 0, weight_scale = 1.
    """
    dims = [input_dim, 500, 500, 250, 250, 250]
    hidden = []
    for i in range(5):
        key, k = jax.random.split(key)
        w = jax.random.normal(k, (dims[i + 1], dims[i]), jnp.float32) * 0.1
        s = jnp.ones((dims[i + 1], 1), jnp.float32)   # weight_scale=None -> 1
        b = jnp.zeros((dims[i + 1],), jnp.float32)
        hidden.append((w, s, b))
    key, k = jax.random.split(key)
    wf = jax.random.normal(k, (output_dim, 250), jnp.float32) * 0.1
    sf = jnp.ones((output_dim, 1), jnp.float32)       # weight_scale=1
    bf = jnp.zeros((output_dim,), jnp.float32)
    return hidden, (wf, sf, bf)


# ---------------------------------------------------------------------------
# Wrappers
# ---------------------------------------------------------------------------

def _fused_forward(x, prepped_layers):
    """One pallas_call for the whole network. Returns (features [B,250], out [B,1])."""
    B, input_dim = x.shape
    n_hidden = len(prepped_layers) - 1
    feat_dim = prepped_layers[-2][0].shape[1]
    out_dim = prepped_layers[-1][0].shape[1]

    # Batch tiling: at small B this is grid=(1,); at large B the "parallel" axis
    # lets both v7x TensorCores work.
    bt = B if B <= 256 else 256
    grid = (pl.cdiv(B, bt),)

    args = [x]
    in_specs = [pl.BlockSpec((bt, input_dim), lambda i: (i, 0))]
    for (w, b) in prepped_layers:
        args += [w, b]
        # Same block index every grid step -> weights stay resident in VMEM.
        in_specs.append(pl.BlockSpec(w.shape, lambda i: (0, 0)))
        in_specs.append(pl.BlockSpec(b.shape, lambda i: (0, 0)))

    kernel = functools.partial(_fused_disc_kernel, n_hidden=n_hidden)
    feat, out = pl.pallas_call(
        kernel,
        out_shape=(jax.ShapeDtypeStruct((B, feat_dim), jnp.float32),
                   jax.ShapeDtypeStruct((B, out_dim), jnp.float32)),
        grid=grid,
        in_specs=in_specs,
        out_specs=(pl.BlockSpec((bt, feat_dim), lambda i: (i, 0)),
                   pl.BlockSpec((bt, out_dim), lambda i: (i, 0))),
        compiler_params=pltpu.CompilerParams(
            dimension_semantics=("parallel",)),
    )(*args)
    return feat, out


def _first_layer_forward(x, w_t, b):
    B, In = x.shape
    Out = w_t.shape[1]
    return pl.pallas_call(
        _single_layer_kernel,
        out_shape=jax.ShapeDtypeStruct((B, Out), jnp.float32),
        grid=(1,),
        in_specs=[pl.BlockSpec((B, In), lambda i: (0, 0)),
                  pl.BlockSpec((In, Out), lambda i: (0, 0)),
                  pl.BlockSpec((1, Out), lambda i: (0, 0))],
        out_specs=pl.BlockSpec((B, Out), lambda i: (0, 0)),
    )(x, w_t, b)


def original_discriminator_forward(x, prepped_layers, input_dim,
                                   feature=False, first=False):
    """Eval-mode forward pass (all training-time noise terms are zero)."""
    x = x.reshape(-1, input_dim).astype(jnp.float32)
    if first:
        w0, b0 = prepped_layers[0]
        return _first_layer_forward(x, w0, b0)
    feat, out = _fused_forward(x, prepped_layers)
    if feature:
        return feat, out
    return out


# ---------------------------------------------------------------------------
# Demo / self-check
# ---------------------------------------------------------------------------

if __name__ == "__main__":
    INPUT_DIM = 28 ** 2   # module default
    OUTPUT_DIM = 1
    BATCH = 8

    key = jax.random.PRNGKey(0)
    key, kx = jax.random.split(key)
    x = jax.random.normal(kx, (BATCH, INPUT_DIM), jnp.float32)

    raw_hidden, raw_final = init_discriminator_params(key, INPUT_DIM, OUTPUT_DIM)
    prepped = prepare_params(raw_hidden, raw_final, weight_dtype=jnp.bfloat16)

    feat, out = original_discriminator_forward(x, prepped, INPUT_DIM, feature=True)
    out = jax.block_until_ready(out)
    feat = jax.block_until_ready(feat)

    # Pure-JAX reference using the same folded weights (mirrors the kernel's
    # bf16 matmul inputs / f32 accumulation).
    def ref_forward(xr, layers):
        h = xr.reshape(-1, INPUT_DIM)
        for w, b in layers[:-1]:
            hq = h.astype(jnp.bfloat16).astype(jnp.float32)
            y = hq @ w.astype(jnp.float32) + b
            h = jnp.where(y > 0, y, jnp.exp(y) - 1.0)
        wf, bf = layers[-1]
        hq = h.astype(jnp.bfloat16).astype(jnp.float32)
        yf = hq @ wf.astype(jnp.float32) + bf
        return h, 1.0 / (1.0 + jnp.exp(-yf))

    ref_feat, ref_out = ref_forward(x, prepped)

    assert out.shape == (BATCH, OUTPUT_DIM)
    assert feat.shape == (BATCH, 250)
    assert bool(jnp.all(jnp.isfinite(out)))
    assert bool(jnp.all(jnp.isfinite(feat)))
    assert bool(jnp.allclose(out, ref_out, atol=1e-2, rtol=1e-2))
    assert bool(jnp.allclose(feat, ref_feat, atol=2e-2, rtol=2e-2))

    # `first=True` path: layers[0](x) with no activation.
    first_out = original_discriminator_forward(x, prepped, INPUT_DIM, first=True)
    first_out = jax.block_until_ready(first_out)
    assert first_out.shape == (BATCH, 500)
    assert bool(jnp.all(jnp.isfinite(first_out)))

    print("KERNEL_OK")
</pallas_src>

<mosaic_0001>
module attributes {stable_mosaic.version = 11 : i64} {
  func.func @_fused_disc_kernel(%arg0: i32, %arg1: memref<8x784xf32, #tpu.memory_space<vmem>>, %arg2: memref<784x500xbf16, #tpu.memory_space<vmem>>, %arg3: memref<1x500xf32, #tpu.memory_space<vmem>>, %arg4: memref<500x500xbf16, #tpu.memory_space<vmem>>, %arg5: memref<1x500xf32, #tpu.memory_space<vmem>>, %arg6: memref<500x250xbf16, #tpu.memory_space<vmem>>, %arg7: memref<1x250xf32, #tpu.memory_space<vmem>>, %arg8: memref<250x250xbf16, #tpu.memory_space<vmem>>, %arg9: memref<1x250xf32, #tpu.memory_space<vmem>>, %arg10: memref<250x250xbf16, #tpu.memory_space<vmem>>, %arg11: memref<1x250xf32, #tpu.memory_space<vmem>>, %arg12: memref<250x1xbf16, #tpu.memory_space<vmem>>, %arg13: memref<1x1xf32, #tpu.memory_space<vmem>>, %arg14: memref<8x250xf32, #tpu.memory_space<vmem>>, %arg15: memref<8x1xf32, #tpu.memory_space<vmem>>) attributes {dimension_semantics = [#tpu.dimension_semantics<parallel>], iteration_bounds = array<i64: 1>, scalar_prefetch = 0 : i64, scratch_operands = 0 : i64, tpu.core_type = #tpu.core_type<tc>, window_params = [{transform_indices = @transform_0, window_bounds = array<i64: 8, 784>}, {pipeline_mode = #tpu.pipeline_mode<synchronous>, transform_indices = @transform_1, window_bounds = array<i64: 784, 500>}, {pipeline_mode = #tpu.pipeline_mode<synchronous>, transform_indices = @transform_2, window_bounds = array<i64: 1, 500>}, {pipeline_mode = #tpu.pipeline_mode<synchronous>, transform_indices = @transform_3, window_bounds = array<i64: 500, 500>}, {pipeline_mode = #tpu.pipeline_mode<synchronous>, transform_indices = @transform_4, window_bounds = array<i64: 1, 500>}, {pipeline_mode = #tpu.pipeline_mode<synchronous>, transform_indices = @transform_5, window_bounds = array<i64: 500, 250>}, {pipeline_mode = #tpu.pipeline_mode<synchronous>, transform_indices = @transform_6, window_bounds = array<i64: 1, 250>}, {pipeline_mode = #tpu.pipeline_mode<synchronous>, transform_indices = @transform_7, window_bounds = array<i64: 250, 250>}, {pipeline_mode = #tpu.pipeline_mode<synchronous>, transform_indices = @transform_8, window_bounds = array<i64: 1, 250>}, {pipeline_mode = #tpu.pipeline_mode<synchronous>, transform_indices = @transform_9, window_bounds = array<i64: 250, 250>}, {pipeline_mode = #tpu.pipeline_mode<synchronous>, transform_indices = @transform_10, window_bounds = array<i64: 1, 250>}, {pipeline_mode = #tpu.pipeline_mode<synchronous>, transform_indices = @transform_11, window_bounds = array<i64: 250, 1>}, {pipeline_mode = #tpu.pipeline_mode<synchronous>, transform_indices = @transform_12, window_bounds = array<i64: 1, 1>}, {transform_indices = @transform_13, window_bounds = array<i64: 8, 250>}, {transform_indices = @transform_14, window_bounds = array<i64: 8, 1>}]} {
    %c0 = arith.constant 0 : index
    %c0_0 = arith.constant 0 : index
    %0 = vector.load %arg1[%c0, %c0_0] : memref<8x784xf32, #tpu.memory_space<vmem>>, vector<8x784xf32>
    %1 = arith.truncf %0 : vector<8x784xf32> to vector<8x784xbf16>
    %c0_1 = arith.constant 0 : index
    %c0_2 = arith.constant 0 : index
    %2 = vector.load %arg2[%c0_1, %c0_2] : memref<784x500xbf16, #tpu.memory_space<vmem>>, vector<784x500xbf16>
    %cst = arith.constant dense<0.000000e+00> : vector<8x500xf32>
    %3 = tpu.matmul %1, %2, %cst {dimension_numbers = #tpu.dot_dimension_numbers<[1], [0], [0], [1], [0, 0, 1, 1], [], []>} : vector<8x784xbf16>, vector<784x500xbf16>, vector<8x500xf32> -> vector<8x500xf32>
    %c0_3 = arith.constant 0 : index
    %c0_4 = arith.constant 0 : index
    %4 = vector.load %arg3[%c0_3, %c0_4] : memref<1x500xf32, #tpu.memory_space<vmem>>, vector<1x500xf32>
    %5 = vector.broadcast %4 : vector<1x500xf32> to vector<8x500xf32>
    %6 = arith.addf %3, %5 : vector<8x500xf32>
    %cst_5 = arith.constant 0.000000e+00 : f32
    %7 = vector.broadcast %cst_5 : f32 to vector<8x500xf32>
    %8 = arith.cmpf ogt, %6, %7 : vector<8x500xf32>
    %9 = math.exp %6 : vector<8x500xf32>
    %cst_6 = arith.constant 1.000000e+00 : f32
    %10 = vector.broadcast %cst_6 : f32 to vector<8x500xf32>
    %11 = arith.subf %9, %10 : vector<8x500xf32>
    %12 = arith.select %8, %6, %11 : vector<8x500xi1>, vector<8x500xf32>
    %13 = arith.truncf %12 : vector<8x500xf32> to vector<8x500xbf16>
    %c0_7 = arith.constant 0 : index
    %c0_8 = arith.constant 0 : index
    %14 = vector.load %arg4[%c0_7, %c0_8] : memref<500x500xbf16, #tpu.memory_space<vmem>>, vector<500x500xbf16>
    %cst_9 = arith.constant dense<0.000000e+00> : vector<8x500xf32>
    %15 = tpu.matmul %13, %14, %cst_9 {dimension_numbers = #tpu.dot_dimension_numbers<[1], [0], [0], [1], [0, 0, 1, 1], [], []>} : vector<8x500xbf16>, vector<500x500xbf16>, vector<8x500xf32> -> vector<8x500xf32>
    %c0_10 = arith.constant 0 : index
    %c0_11 = arith.constant 0 : index
    %16 = vector.load %arg5[%c0_10, %c0_11] : memref<1x500xf32, #tpu.memory_space<vmem>>, vector<1x500xf32>
    %17 = vector.broadcast %16 : vector<1x500xf32> to vector<8x500xf32>
    %18 = arith.addf %15, %17 : vector<8x500xf32>
    %cst_12 = arith.constant 0.000000e+00 : f32
    %19 = vector.broadcast %cst_12 : f32 to vector<8x500xf32>
    %20 = arith.cmpf ogt, %18, %19 : vector<8x500xf32>
    %21 = math.exp %18 : vector<8x500xf32>
    %cst_13 = arith.constant 1.000000e+00 : f32
    %22 = vector.broadcast %cst_13 : f32 to vector<8x500xf32>
    %23 = arith.subf %21, %22 : vector<8x500xf32>
    %24 = arith.select %20, %18, %23 : vector<8x500xi1>, vector<8x500xf32>
    %25 = arith.truncf %24 : vector<8x500xf32> to vector<8x500xbf16>
    %c0_14 = arith.constant 0 : index
    %c0_15 = arith.constant 0 : index
    %26 = vector.load %arg6[%c0_14, %c0_15] : memref<500x250xbf16, #tpu.memory_space<vmem>>, vector<500x250xbf16>
    %cst_16 = arith.constant dense<0.000000e+00> : vector<8x250xf32>
    %27 = tpu.matmul %25, %26, %cst_16 {dimension_numbers = #tpu.dot_dimension_numbers<[1], [0], [0], [1], [0, 0, 1, 1], [], []>} : vector<8x500xbf16>, vector<500x250xbf16>, vector<8x250xf32> -> vector<8x250xf32>
    %c0_17 = arith.constant 0 : index
    %c0_18 = arith.constant 0 : index
    %28 = vector.load %arg7[%c0_17, %c0_18] : memref<1x250xf32, #tpu.memory_space<vmem>>, vector<1x250xf32>
    %29 = vector.broadcast %28 : vector<1x250xf32> to vector<8x250xf32>
    %30 = arith.addf %27, %29 : vector<8x250xf32>
    %cst_19 = arith.constant 0.000000e+00 : f32
    %31 = vector.broadcast %cst_19 : f32 to vector<8x250xf32>
    %32 = arith.cmpf ogt, %30, %31 : vector<8x250xf32>
    %33 = math.exp %30 : vector<8x250xf32>
    %cst_20 = arith.constant 1.000000e+00 : f32
    %34 = vector.broadcast %cst_20 : f32 to vector<8x250xf32>
    %35 = arith.subf %33, %34 : vector<8x250xf32>
    %36 = arith.select %32, %30, %35 : vector<8x250xi1>, vector<8x250xf32>
    %37 = arith.truncf %36 : vector<8x250xf32> to vector<8x250xbf16>
    %c0_21 = arith.constant 0 : index
    %c0_22 = arith.constant 0 : index
    %38 = vector.load %arg8[%c0_21, %c0_22] : memref<250x250xbf16, #tpu.memory_space<vmem>>, vector<250x250xbf16>
    %cst_23 = arith.constant dense<0.000000e+00> : vector<8x250xf32>
    %39 = tpu.matmul %37, %38, %cst_23 {dimension_numbers = #tpu.dot_dimension_numbers<[1], [0], [0], [1], [0, 0, 1, 1], [], []>} : vector<8x250xbf16>, vector<250x250xbf16>, vector<8x250xf32> -> vector<8x250xf32>
    %c0_24 = arith.constant 0 : index
    %c0_25 = arith.constant 0 : index
    %40 = vector.load %arg9[%c0_24, %c0_25] : memref<1x250xf32, #tpu.memory_space<vmem>>, vector<1x250xf32>
    %41 = vector.broadcast %40 : vector<1x250xf32> to vector<8x250xf32>
    %42 = arith.addf %39, %41 : vector<8x250xf32>
    %cst_26 = arith.constant 0.000000e+00 : f32
    %43 = vector.broadcast %cst_26 : f32 to vector<8x250xf32>
    %44 = arith.cmpf ogt, %42, %43 : vector<8x250xf32>
    %45 = math.exp %42 : vector<8x250xf32>
    %cst_27 = arith.constant 1.000000e+00 : f32
    %46 = vector.broadcast %cst_27 : f32 to vector<8x250xf32>
    %47 = arith.subf %45, %46 : vector<8x250xf32>
    %48 = arith.select %44, %42, %47 : vector<8x250xi1>, vector<8x250xf32>
    %49 = arith.truncf %48 : vector<8x250xf32> to vector<8x250xbf16>
    %c0_28 = arith.constant 0 : index
    %c0_29 = arith.constant 0 : index
    %50 = vector.load %arg10[%c0_28, %c0_29] : memref<250x250xbf16, #tpu.memory_space<vmem>>, vector<250x250xbf16>
    %cst_30 = arith.constant dense<0.000000e+00> : vector<8x250xf32>
    %51 = tpu.matmul %49, %50, %cst_30 {dimension_numbers = #tpu.dot_dimension_numbers<[1], [0], [0], [1], [0, 0, 1, 1], [], []>} : vector<8x250xbf16>, vector<250x250xbf16>, vector<8x250xf32> -> vector<8x250xf32>
    %c0_31 = arith.constant 0 : index
    %c0_32 = arith.constant 0 : index
    %52 = vector.load %arg11[%c0_31, %c0_32] : memref<1x250xf32, #tpu.memory_space<vmem>>, vector<1x250xf32>
    %53 = vector.broadcast %52 : vector<1x250xf32> to vector<8x250xf32>
    %54 = arith.addf %51, %53 : vector<8x250xf32>
    %cst_33 = arith.constant 0.000000e+00 : f32
    %55 = vector.broadcast %cst_33 : f32 to vector<8x250xf32>
    %56 = arith.cmpf ogt, %54, %55 : vector<8x250xf32>
    %57 = math.exp %54 : vector<8x250xf32>
    %cst_34 = arith.constant 1.000000e+00 : f32
    %58 = vector.broadcast %cst_34 : f32 to vector<8x250xf32>
    %59 = arith.subf %57, %58 : vector<8x250xf32>
    %60 = arith.select %56, %54, %59 : vector<8x250xi1>, vector<8x250xf32>
    %c0_35 = arith.constant 0 : index
    %c0_36 = arith.constant 0 : index
    %61 = vector.load %arg14[%c0_35, %c0_36] : memref<8x250xf32, #tpu.memory_space<vmem>>, vector<8x250xf32>
    tpu.vector_store %arg14[%c0_35, %c0_36], %60 {strides = array<i32>} : memref<8x250xf32, #tpu.memory_space<vmem>>, vector<8x250xf32>,
    %62 = arith.truncf %60 : vector<8x250xf32> to vector<8x250xbf16>
    %c0_37 = arith.constant 0 : index
    %c0_38 = arith.constant 0 : index
    %63 = vector.load %arg12[%c0_37, %c0_38] : memref<250x1xbf16, #tpu.memory_space<vmem>>, vector<250x1xbf16>
    %cst_39 = arith.constant dense<0.000000e+00> : vector<8x1xf32>
    %64 = tpu.matmul %62, %63, %cst_39 {dimension_numbers = #tpu.dot_dimension_numbers<[1], [0], [0], [1], [0, 0, 1, 1], [], []>} : vector<8x250xbf16>, vector<250x1xbf16>, vector<8x1xf32> -> vector<8x1xf32>
    %c0_40 = arith.constant 0 : index
    %c0_41 = arith.constant 0 : index
    %65 = vector.load %arg13[%c0_40, %c0_41] : memref<1x1xf32, #tpu.memory_space<vmem>>, vector<1x1xf32>
    %66 = vector.broadcast %65 : vector<1x1xf32> to vector<8x1xf32>
    %67 = arith.addf %64, %66 : vector<8x1xf32>
    %cst_42 = arith.constant 0.000000e+00 : f32
    %68 = vector.broadcast %cst_42 : f32 to vector<8x1xf32>
    %69 = arith.subf %68, %67 : vector<8x1xf32>
    %70 = math.exp %69 : vector<8x1xf32>
    %cst_43 = arith.constant 1.000000e+00 : f32
    %71 = vector.broadcast %cst_43 : f32 to vector<8x1xf32>
    %72 = arith.addf %71, %70 : vector<8x1xf32>
    %cst_44 = arith.constant 1.000000e+00 : f32
    %73 = vector.broadcast %cst_44 : f32 to vector<8x1xf32>
    %74 = arith.divf %73, %72 : vector<8x1xf32>
    %c0_45 = arith.constant 0 : index
    %c0_46 = arith.constant 0 : index
    %75 = vector.load %arg15[%c0_45, %c0_46] : memref<8x1xf32, #tpu.memory_space<vmem>>, vector<8x1xf32>
    tpu.vector_store %arg15[%c0_45, %c0_46], %74 {strides = array<i32>} : memref<8x1xf32, #tpu.memory_space<vmem>>, vector<8x1xf32>,
    return
  }
  func.func @transform_0(%arg0: i32) -> (i32, i32) {
    %c0_i32 = arith.constant 0 : i32
    %c0_i32_0 = arith.constant 0 : i32
    return %arg0, %c0_i32 : i32, i32
  }
  func.func @transform_1(%arg0: i32) -> (i32, i32) {
    %c0_i32 = arith.constant 0 : i32
    %c0_i32_0 = arith.constant 0 : i32
    %c0_i32_1 = arith.constant 0 : i32
    return %c0_i32, %c0_i32_0 : i32, i32
  }
  func.func @transform_2(%arg0: i32) -> (i32, i32) {
    %c0_i32 = arith.constant 0 : i32
    %c0_i32_0 = arith.constant 0 : i32
    %c0_i32_1 = arith.constant 0 : i32
    return %c0_i32, %c0_i32_0 : i32, i32
  }
  func.func @transform_3(%arg0: i32) -> (i32, i32) {
    %c0_i32 = arith.constant 0 : i32
    %c0_i32_0 = arith.constant 0 : i32
    %c0_i32_1 = arith.constant 0 : i32
    return %c0_i32, %c0_i32_0 : i32, i32
  }
  func.func @transform_4(%arg0: i32) -> (i32, i32) {
    %c0_i32 = arith.constant 0 : i32
    %c0_i32_0 = arith.constant 0 : i32
    %c0_i32_1 = arith.constant 0 : i32
    return %c0_i32, %c0_i32_0 : i32, i32
  }
  func.func @transform_5(%arg0: i32) -> (i32, i32) {
    %c0_i32 = arith.constant 0 : i32
    %c0_i32_0 = arith.constant 0 : i32
    %c0_i32_1 = arith.constant 0 : i32
    return %c0_i32, %c0_i32_0 : i32, i32
  }
  func.func @transform_6(%arg0: i32) -> (i32, i32) {
    %c0_i32 = arith.constant 0 : i32
    %c0_i32_0 = arith.constant 0 : i32
    %c0_i32_1 = arith.constant 0 : i32
    return %c0_i32, %c0_i32_0 : i32, i32
  }
  func.func @transform_7(%arg0: i32) -> (i32, i32) {
    %c0_i32 = arith.constant 0 : i32
    %c0_i32_0 = arith.constant 0 : i32
    %c0_i32_1 = arith.constant 0 : i32
    return %c0_i32, %c0_i32_0 : i32, i32
  }
  func.func @transform_8(%arg0: i32) -> (i32, i32) {
    %c0_i32 = arith.constant 0 : i32
    %c0_i32_0 = arith.constant 0 : i32
    %c0_i32_1 = arith.constant 0 : i32
    return %c0_i32, %c0_i32_0 : i32, i32
  }
  func.func @transform_9(%arg0: i32) -> (i32, i32) {
    %c0_i32 = arith.constant 0 : i32
    %c0_i32_0 = arith.constant 0 : i32
    %c0_i32_1 = arith.constant 0 : i32
    return %c0_i32, %c0_i32_0 : i32, i32
  }
  func.func @transform_10(%arg0: i32) -> (i32, i32) {
    %c0_i32 = arith.constant 0 : i32
    %c0_i32_0 = arith.constant 0 : i32
    %c0_i32_1 = arith.constant 0 : i32
    return %c0_i32, %c0_i32_0 : i32, i32
  }
  func.func @transform_11(%arg0: i32) -> (i32, i32) {
    %c0_i32 = arith.constant 0 : i32
    %c0_i32_0 = arith.constant 0 : i32
    %c0_i32_1 = arith.constant 0 : i32
    return %c0_i32, %c0_i32_0 : i32, i32
  }
  func.func @transform_12(%arg0: i32) -> (i32, i32) {
    %c0_i32 = arith.constant 0 : i32
    %c0_i32_0 = arith.constant 0 : i32
    %c0_i32_1 = arith.constant 0 : i32
    return %c0_i32, %c0_i32_0 : i32, i32
  }
  func.func @transform_13(%arg0: i32) -> (i32, i32) {
    %c0_i32 = arith.constant 0 : i32
    %c0_i32_0 = arith.constant 0 : i32
    return %arg0, %c0_i32 : i32, i32
  }
  func.func @transform_14(%arg0: i32) -> (i32, i32) {
    %c0_i32 = arith.constant 0 : i32
    %c0_i32_0 = arith.constant 0 : i32
    return %arg0, %c0_i32 : i32, i32
  }
}

</mosaic_0001>

<bundles_post_ra>
// kernel: tpu_custom_call.1
= control target key start
LH: loop header
LB: loop body
LE: loop exit
PB: predicated region body
PF: predicated region fallthrough
CT: control target
= control target key end

     0   :  { %s5594_s0 = inlined_call_operand.vmem [shape: f32[8,784], index: 0, kind: input, shape index: {}]   ;;  %s5595_s1 = inlined_call_operand.hbm [shape: bf16[784,500], index: 1, kind: input, shape index: {}]   ;;  %s5596_s2 = inlined_call_operand.vmem [shape: f32[1,500], index: 2, kind: input, shape index: {}]   ;;  %s5597_s3 = inlined_call_operand.hbm [shape: bf16[500,500], index: 3, kind: input, shape index: {}]   ;;  %s5598_s4 = inlined_call_operand.vmem [shape: f32[1,500], index: 4, kind: input, shape index: {}]   ;;  %s5599_s5 = inlined_call_operand.hbm [shape: bf16[500,250], index: 5, kind: input, shape index: {}]   ;;  %s5600_s6 = inlined_call_operand.vmem [shape: f32[1,250], index: 6, kind: input, shape index: {}]   ;;  %s5601_s7 = inlined_call_operand.hbm [shape: bf16[250,250], index: 7, kind: input, shape index: {}]   ;;  %s5602_s8 = inlined_call_operand.vmem [shape: f32[1,250], index: 8, kind: input, shape index: {}]   ;;  %s5603_s9 = inlined_call_operand.hbm [shape: bf16[250,250], index: 9, kind: input, shape index: {}]   ;;  %s5604_s10 = inlined_call_operand.vmem [shape: f32[1,250], index: 10, kind: input, shape index: {}]   ;;  %s5605_s11 = inlined_call_operand.vmem [shape: bf16[250,1], index: 11, kind: input, shape index: {}]   ;;  %s5606_s12 = inlined_call_operand.<no memory space> [shape: f32[1,1], index: 12, kind: input, shape index: {}]   ;;  %s5607_s13 = inlined_call_operand.hbm [shape: f32[8,250], index: 13, kind: output, shape index: {0}]   ;;  %s5608_s14 = inlined_call_operand.vmem [shape: f32[8,1], index: 14, kind: output, shape index: {1}]  }
   0x1   :  { %v20_v0 = vstv %s5606_s12 }
   0x2   :  { %21 = vst [vmem:[#allocation2] sm:$0x1] %v20_v0 }
   0x3   :  { %22 = vsyncpa [#allocation4], 0 }
   0x4   :  { %23 = vsyncpa [#allocation7], 0 }
   0x5   :  { %24 = vsyncpa [#allocation10], 0 }
   0x6   :  { %25 = vsyncpa [#allocation5], 0  ;;  %s5284_s15 = smov [#allocation6]  }
   0x7   :  { %s47_s16 = sshll.u32 %s5284_s15, 4  ;;  %s48_s16 = int_to_ptr.vmem [resolvable:$true] %s47_s16 }
   0x8   :  { %s5164_s17 = scalar_lea.vmem %s48_s16, 16128  ;;  %p5169_p1 = scmp.lt.s32.totalorder %s48_s16, %s48_s16 }
   0x9   :  { %p5165_p0 = scmp.ne.s32.totalorder %s48_s16, %s5164_s17  ;;  %p5170_p2 = scmp.lt.s32.totalorder %s5164_s17, %s5164_s17 }
   0xb   :  { %p5171_p3 = por %p5170_p2, %p5169_p1 }
   0xd   :  { %p5172_p4 = pnand %p5171_p3, %p5165_p0 }
   0xf   :  { %5175 = shalt.err (!%p5172_p4)
}
  0x10   :  { %s5285_s18 = smov 256   ;;  %s5286_s19 = smov 16  }
  0x11   :  { %53 = dma.hbm_to_vmem [thread:$0]  %s5597_s3, 16128, %s48_s16, [#allocation7], %s5285_s18, %s5285_s18, %s5286_s19  }
  0x12   :  { %s5287_s12 = smov [#allocation9]   ;;  %s5288_s23 = smov [#allocation3]  }
  0x13   :  { %s75_s22 = sshll.u32 %s5287_s12, 4  ;;  %s33_s24 = sshll.u32 %s5288_s23, 4  ;;  %s76_s22 = int_to_ptr.vmem [resolvable:$true] %s75_s22  ;;  %s34_s24 = int_to_ptr.vmem [resolvable:$true] %s33_s24 }
  0x14   :  { %s5184_s25 = scalar_lea.vmem %s76_s22, 4096  ;;  %p5189_p6 = scmp.lt.s32.totalorder %s76_s22, %s76_s22 }
  0x15   :  { %p5185_p5 = scmp.ne.s32.totalorder %s76_s22, %s5184_s25  ;;  %p5190_p7 = scmp.lt.s32.totalorder %s5184_s25, %s5184_s25 }
  0x17   :  { %p5191_p8 = por %p5190_p7, %p5189_p6 }
  0x19   :  { %p5192_p9 = pnand %p5191_p8, %p5185_p5 }
  0x1b   :  { %5195 = shalt.err (!%p5192_p9)
}
  0x1c   :  { %s5289_s26 = smov 128   ;;  %s5290_s27 = smov 8  }
  0x1d   :  { %81 = dma.hbm_to_vmem [thread:$0]  %s5601_s7, 4096, %s76_s22, [#allocation10], %s5289_s26, %s5289_s26, %s5290_s27  }
  0x1e   :  { %s5204_s3 = scalar_lea.vmem %s34_s24, 25088  ;;  %p5209_p11 = scmp.lt.s32.totalorder %s34_s24, %s34_s24 }
  0x1f   :  { %p5205_p10 = scmp.ne.s32.totalorder %s34_s24, %s5204_s3  ;;  %p5210_p12 = scmp.lt.s32.totalorder %s5204_s3, %s5204_s3 }
  0x21   :  { %p5211_p13 = por %p5210_p12, %p5209_p11 }
  0x23   :  { %p5212_p0 = pnand %p5211_p13, %p5205_p10 }
  0x25   :  { %5215 = shalt.err (!%p5212_p0)
}
  0x26   :  { %39 = dma.hbm_to_vmem [thread:$0]  %s5595_s1, 25088, %s34_s24, [#allocation4], %s5285_s18, %s5285_s18, %s5286_s19  }
  0x27   :  { %s5291_s16 = smov [#allocation8]   ;;  %s5292_s20 = smov [#allocation11]  }
  0x28   :  { %s61_s17 = sshll.u32 %s5291_s16, 4  ;;  %s89_s21 = sshll.u32 %s5292_s20, 4  ;;  %s62_s17 = int_to_ptr.vmem [resolvable:$true] %s61_s17  ;;  %s90_s21 = int_to_ptr.vmem [resolvable:$true] %s89_s21 }
  0x29   :  { %s5224_s12 = scalar_lea.vmem %s62_s17, 8064  ;;  %p5229_p2 = scmp.lt.s32.totalorder %s62_s17, %s62_s17 }
  0x2a   :  { %p5225_p1 = scmp.ne.s32.totalorder %s62_s17, %s5224_s12  ;;  %p5230_p3 = scmp.lt.s32.totalorder %s5224_s12, %s5224_s12 }
  0x2c   :  { %p5231_p4 = por %p5230_p3, %p5229_p2 }
  0x2e   :  { %p5232_p5 = pnand %p5231_p4, %p5225_p1 }
  0x30   :  { %5235 = shalt.err (!%p5232_p5)
}
  0x31   :  { %67 = dma.hbm_to_vmem [thread:$0]  %s5599_s5, 8064, %s62_s17, [#allocation7], %s5289_s26, %s5289_s26, %s5290_s27  }
  0x32   :  { %s5244_s1 = scalar_lea.vmem %s90_s21, 4096  ;;  %p5249_p7 = scmp.lt.s32.totalorder %s90_s21, %s90_s21 }
  0x33   :  { %p5245_p6 = scmp.ne.s32.totalorder %s90_s21, %s5244_s1  ;;  %p5250_p8 = scmp.lt.s32.totalorder %s5244_s1, %s5244_s1 }
  0x35   :  { %p5251_p9 = por %p5250_p8, %p5249_p7 }
  0x37   :  { %p5252_p10 = pnand %p5251_p9, %p5245_p6 }
  0x39   :  { %5255 = shalt.err (!%p5252_p10)
}
  0x3a   :  { %95 = dma.hbm_to_vmem [thread:$0]  %s5603_s9, 4096, %s90_s21, [#allocation10], %s5289_s26, %s5289_s26, %s5290_s27  }
  0x3b   :  { %5276 = dma.done.wait [#allocation4], 25088  }
  0x3c   :  { %5277 = vsyncadd [#allocation4], 4294942208 }
  0x3d   :  { %5278 = dma.done.wait [#allocation7], 24192  }
  0x3e   :  { %5279 = vsyncadd [#allocation7], 4294943104 }
  0x3f   :  { %5280 = dma.done.wait [#allocation10], 8192  }
  0x40   :  { %5281 = vsyncadd [#allocation10], 4294959104  ;;  %v4433_v1 = vld [vmem:[#allocation3 + $0xe4] ss:$16 sps:$4 sm:$0xff]   ;;  %v4437_v3 = vld [vmem:[#allocation3 + $0xe0] ss:$16 sps:$4 sm:$0xff]  }
  0x41   :  { %v4435_v2 = vld [vmem:[#allocation3 + $0x2e4] ss:$16 sps:$4 sm:$0xff]   ;;  %1334 = vmatprep.subr.bf16.mxu0 %v4433_v1  ;;  %v4438_v4 = vld [vmem:[#allocation3 + $0x2e0] ss:$16 sps:$4 sm:$0xff]   ;;  %vm1330_vm0 = vcmask 130048   ;;  %vm2468_vm1 = vcmask 1041408  }
  0x42   :  { %1375 = vmatprep.subr.bf16.mxu1 %v4435_v2  ;;  %v4439_v5 = vld [vmem:[#allocation3 + $0xc4] ss:$16 sps:$4 sm:$0xff]   ;;  %1335 = vmatpush1.bf16.msra.mxu0 %v4437_v3  ;;  %v4443_v7 = vld [vmem:[#allocation3 + $0xc0] ss:$16 sps:$4 sm:$0xff]   ;;  %vm2464_vm6 = vcmask 949248   ;;  %vm3368_vm11 = vcmask 1044480  }
  0x43   :  { %1376 = vmatpush1.bf16.msra.mxu1 %v4438_v4  ;;  %v4441_v6 = vld [vmem:[#allocation3 + $0x2c4] ss:$16 sps:$4 sm:$0xff]   ;;  %1336 = vmatprep.subr.bf16.mxu0 %v4439_v5  ;;  %v4444_v8 = vld [vmem:[#allocation3 + $0x2c0] ss:$16 sps:$4 sm:$0xff]   ;;  %vm3364_vm14 = vcmask 998400  }
  0x44   :  { %1377 = vmatprep.subr.bf16.mxu1 %v4441_v6  ;;  %v4445_v9 = vld [vmem:[#allocation3 + $0xa4] ss:$16 sps:$4 sm:$0xff]   ;;  %v4449_v11 = vld [vmem:[#allocation3 + $0xa0] ss:$16 sps:$4 sm:$0xff]  }
  0x45   :  { %v4447_v10 = vld [vmem:[#allocation3 + $0x2a4] ss:$16 sps:$4 sm:$0xff]   ;;  %v4450_v12 = vld [vmem:[#allocation3 + $0x2a0] ss:$16 sps:$4 sm:$0xff]  }
  0x46   :  { %1337 = vmatpush1.bf16.msra.mxu0 %v4443_v7  ;;  %v4451_v13 = vld [vmem:[#allocation3 + $0x84] ss:$16 sps:$4 sm:$0xff]   ;;  %v4455_v15 = vld [vmem:[#allocation3 + $0x80] ss:$16 sps:$4 sm:$0xff]  }
  0x47   :  { %1378 = vmatpush1.bf16.msra.mxu1 %v4444_v8  ;;  %1338 = vmatprep.subr.bf16.mxu0 %v4445_v9  ;;  %v4453_v14 = vld [vmem:[#allocation3 + $0x284] ss:$16 sps:$4 sm:$0xff]   ;;  %v4456_v16 = vld [vmem:[#allocation3 + $0x280] ss:$16 sps:$4 sm:$0xff]  }
  0x48   :  { %1379 = vmatprep.subr.bf16.mxu1 %v4447_v10  ;;  %v4457_v17 = vld [vmem:[#allocation3 + $0x64] ss:$16 sps:$4 sm:$0xff]   ;;  %v4461_v19 = vld [vmem:[#allocation3 + $0x60] ss:$16 sps:$4 sm:$0xff]  }
  0x49   :  { %v4459_v18 = vld [vmem:[#allocation3 + $0x264] ss:$16 sps:$4 sm:$0xff]   ;;  %v4462_v20 = vld [vmem:[#allocation3 + $0x260] ss:$16 sps:$4 sm:$0xff]  }
  0x4a   :  { %1339 = vmatpush1.bf16.msra.mxu0 %v4449_v11  ;;  %v4463_v21 = vld [vmem:[#allocation3 + $0x44] ss:$16 sps:$4 sm:$0xff]   ;;  %v4467_v23 = vld [vmem:[#allocation3 + $0x40] ss:$16 sps:$4 sm:$0xff]  }
  0x4b   :  { %1380 = vmatpush1.bf16.msra.mxu1 %v4450_v12  ;;  %1340 = vmatprep.subr.bf16.mxu0 %v4451_v13  ;;  %v4465_v22 = vld [vmem:[#allocation3 + $0x244] ss:$16 sps:$4 sm:$0xff]   ;;  %v4468_v24 = vld [vmem:[#allocation3 + $0x240] ss:$16 sps:$4 sm:$0xff]  }
  0x4c   :  { %1381 = vmatprep.subr.bf16.mxu1 %v4453_v14  ;;  %v4469_v25 = vld [vmem:[#allocation3 + $0x24] ss:$16 sps:$4 sm:$0xff]   ;;  %v4473_v27 = vld [vmem:[#allocation3 + $0x20] ss:$16 sps:$4 sm:$0xff]   ;;  %v4540_v14 = vld [vmem:[#allocation3 + $0xec] ss:$16 sps:$4 sm:$0xff]  }
  0x4d   :  { %v4471_v26 = vld [vmem:[#allocation3 + $0x224] ss:$16 sps:$4 sm:$0xff]   ;;  %v4474_v28 = vld [vmem:[#allocation3 + $0x220] ss:$16 sps:$4 sm:$0xff]  }
  0x4e   :  { %1341 = vmatpush1.bf16.msra.mxu0 %v4455_v15  ;;  %v4475_v29 = vld [vmem:[#allocation3 + $0x4] ss:$16 sps:$4 sm:$0xff]   ;;  %v4479_v31 = vld [vmem:[#allocation3] ss:$16 sps:$4 sm:$0xff]  }
  0x4f   :  { %1382 = vmatpush1.bf16.msra.mxu1 %v4456_v16  ;;  %1342 = vmatprep.subr.bf16.mxu0 %v4457_v17  ;;  %v4477_v30 = vld [vmem:[#allocation3 + $0x204] ss:$16 sps:$4 sm:$0xff]   ;;  %v4480_v32 = vld [vmem:[#allocation3 + $0x200] ss:$16 sps:$4 sm:$0xff]   ;;  %v5293_v17 = vmov 0  }
  0x50   :  { %1383 = vmatprep.subr.bf16.mxu1 %v4459_v18  ;;  %v4481_v33 = vld [vmem:[#allocation3 + $0x1e4] ss:$16 sps:$4 sm:$0xff]   ;;  %v4485_v35 = vld [vmem:[#allocation3 + $0x1e0] ss:$16 sps:$4 sm:$0xff]  }
  0x51   :  { %v4483_v34 = vld [vmem:[#allocation3 + $0x3e4] ss:$16 sps:$4 sm:$0xff]   ;;  %v4486_v36 = vld [vmem:[#allocation3 + $0x3e0] ss:$16 sps:$4 sm:$0xff]  }
  0x52   :  { %1343 = vmatpush1.bf16.msra.mxu0 %v4461_v19  ;;  %v4487_v37 = vld [vmem:[#allocation3 + $0x1c4] ss:$16 sps:$4 sm:$0xff]   ;;  %v4491_v39 = vld [vmem:[#allocation3 + $0x1c0] ss:$16 sps:$4 sm:$0xff]   ;;  %v4538_v19 = vld [vmem:[#allocation3 + $0xe8] ss:$16 sps:$4 sm:$0xff]  }
  0x53   :  { %1384 = vmatpush1.bf16.msra.mxu1 %v4462_v20  ;;  %1344 = vmatprep.subr.bf16.mxu0 %v4463_v21  ;;  %v4489_v38 = vld [vmem:[#allocation3 + $0x3c4] ss:$16 sps:$4 sm:$0xff]   ;;  %v4492_v40 = vld [vmem:[#allocation3 + $0x3c0] ss:$16 sps:$4 sm:$0xff]  }
  0x54   :  { %1385 = vmatprep.subr.bf16.mxu1 %v4465_v22  ;;  %v4493_v41 = vld [vmem:[#allocation3 + $0x1a4] ss:$16 sps:$4 sm:$0xff]   ;;  %v4497_v43 = vld [vmem:[#allocation3 + $0x1a0] ss:$16 sps:$4 sm:$0xff]   ;;  %v4546_v22 = vld [vmem:[#allocation3 + $0xcc] ss:$16 sps:$4 sm:$0xff]  }
  0x55   :  { %v4495_v42 = vld [vmem:[#allocation3 + $0x3a4] ss:$16 sps:$4 sm:$0xff]   ;;  %v4498_v44 = vld [vmem:[#allocation3 + $0x3a0] ss:$16 sps:$4 sm:$0xff]  }
  0x56   :  { %1345 = vmatpush1.bf16.msra.mxu0 %v4467_v23  ;;  %v4499_v45 = vld [vmem:[#allocation3 + $0x184] ss:$16 sps:$4 sm:$0xff]   ;;  %v4503_v48 = vld [vmem:[#allocation3 + $0x180] ss:$16 sps:$4 sm:$0xff]  }
  0x57   :  { %1386 = vmatpush1.bf16.msra.mxu1 %v4468_v24  ;;  %1346 = vmatprep.subr.bf16.mxu0 %v4469_v25  ;;  %v4501_v46 = vld [vmem:[#allocation3 + $0x384] ss:$16 sps:$4 sm:$0xff]   ;;  %v4504_v49 = vld [vmem:[#allocation3 + $0x380] ss:$16 sps:$4 sm:$0xff]   ;;  %v4544_v24 = vld [vmem:[#allocation3 + $0xc8] ss:$16 sps:$4 sm:$0xff]  }
  0x58   :  { %1387 = vmatprep.subr.bf16.mxu1 %v4471_v26  ;;  %v119_v47 = vld [vmem:[%s5594_s0 + $0x8] sm:$0xff]  ;;  %v121_v51 = vld [vmem:[%s5594_s0 + $0x18] sm:$0xff]  ;;  %v4509_v55 = vld [vmem:[#allocation3 + $0x160] ss:$16 sps:$4 sm:$0xff]  }
  0x59   :  { %v5400_v50 = vpack.c.bf16 %v119_v47, %v119_v47  ;;  %v4505_v52 = vld [vmem:[#allocation3 + $0x164] ss:$16 sps:$4 sm:$0xff]   ;;  %v5405_v53 = vpack.c.bf16 %v121_v51, %v121_v51  ;;  %v4510_v56 = vld [vmem:[#allocation3 + $0x360] ss:$16 sps:$4 sm:$0xff]   ;;  %v4552_v26 = vld [vmem:[#allocation3 + $0xac] ss:$16 sps:$4 sm:$0xff]  }
  0x5a   :  { %1347 = vmatpush1.bf16.msra.mxu0 %v4473_v27  ;;  %v4507_v54 = vld [vmem:[#allocation3 + $0x364] ss:$16 sps:$4 sm:$0xff]   ;;  %v4515_v59 = vld [vmem:[#allocation3 + $0x140] ss:$16 sps:$4 sm:$0xff]  }
  0x5b   :  { %1388 = vmatpush1.bf16.msra.mxu1 %v4474_v28  ;;  %1348 = vmatprep.subr.bf16.mxu0 %v4475_v29  ;;  %v4511_v57 = vld [vmem:[#allocation3 + $0x144] ss:$16 sps:$4 sm:$0xff]   ;;  %v4516_v60 = vld [vmem:[#allocation3 + $0x340] ss:$16 sps:$4 sm:$0xff]   ;;  %v4550_v28 = vld [vmem:[#allocation3 + $0xa8] ss:$16 sps:$4 sm:$0xff]  }
  0x5c   :  { %1389 = vmatprep.subr.bf16.mxu1 %v4477_v30  ;;  %1366 = vmatprep.mubr.bf16.mxu0 %v5400_v50  ;;  %v4513_v58 = vld [vmem:[#allocation3 + $0x344] ss:$16 sps:$4 sm:$0xff]   ;;  %v4521_v63 = vld [vmem:[#allocation3 + $0x120] ss:$16 sps:$4 sm:$0xff]   ;;  %v4558_v30 = vld [vmem:[#allocation3 + $0x8c] ss:$16 sps:$4 sm:$0xff]  }
  0x5d   :  { %1407 = vmatprep.mubr.bf16.mxu1 %v5405_v53  ;;  %v4517_v61 = vld [vmem:[#allocation3 + $0x124] ss:$16 sps:$4 sm:$0xff]   ;;  %v4522_v0 = vld [vmem:[#allocation3 + $0x320] ss:$16 sps:$4 sm:$0xff]  }
  0x5e   :  { %1349 = vmatpush1.bf16.msra.mxu0 %v4479_v31  ;;  %v4519_v62 = vld [vmem:[#allocation3 + $0x324] ss:$16 sps:$4 sm:$0xff]   ;;  %v4527_v3 = vld [vmem:[#allocation3 + $0x100] ss:$16 sps:$4 sm:$0xff]  }
  0x5f   :  { %1390 = vmatpush1.bf16.msra.mxu1 %v4480_v32  ;;  %1350 = vmatprep.subr.bf16.mxu0 %v4481_v33  ;;  %v4523_v1 = vld [vmem:[#allocation3 + $0x104] ss:$16 sps:$4 sm:$0xff]   ;;  %v4528_v4 = vld [vmem:[#allocation3 + $0x300] ss:$16 sps:$4 sm:$0xff]   ;;  %v4556_v32 = vld [vmem:[#allocation3 + $0x88] ss:$16 sps:$4 sm:$0xff]  }
  0x60   :  { %1391 = vmatprep.subr.bf16.mxu1 %v4483_v34  ;;  %v4525_v2 = vld [vmem:[#allocation3 + $0x304] ss:$16 sps:$4 sm:$0xff]   ;;  %v4529_v11 = vld [vmem:[#allocation3 + $0x4e0] ss:$16 sps:$4 sm:$0xff]   ;;  %v4564_v34 = vld [vmem:[#allocation3 + $0x6c] ss:$16 sps:$4 sm:$0xff]  }
  0x61   :  { %v118_v5 = vld [vmem:[%s5594_s0] sm:$0xff]  ;;  %v120_v6 = vld [vmem:[%s5594_s0 + $0x10] sm:$0xff] }
  0x62   :  { %1351 = vmatpush2.bf16.msra.mxu0 %v4485_v35  ;;  %v4531_v7 = vld [vmem:[#allocation3 + $0x4e4] ss:$16 sps:$4 sm:$0xff]   ;;  %v5415_v9 = vpack.c.bf16 %v118_v5, %v118_v5  ;;  %v5417_v10 = vpack.c.bf16 %v120_v6, %v120_v6  ;;  %v4532_v12 = vld [vmem:[#allocation3 + $0x600] ss:$16 sps:$4 sm:$0xff]   ;;  %v4612_v5 = vld [vmem:[#allocation3 + $0x16c] ss:$16 sps:$4 sm:$0xff]  }
  0x63   :  { %1392 = vmatpush2.bf16.msra.mxu1 %v4486_v36  ;;  %1352 = vmatprep.subr.bf16.mxu0 %v4487_v37  ;;  %v4534_v8 = vld [vmem:[#allocation3 + $0x604] ss:$16 sps:$4 sm:$0xff]   ;;  %v4535_v15 = vld [vmem:[#allocation3 + $0x4c0] ss:$16 sps:$4 sm:$0xff]  }
  0x64   :  { %1393 = vmatprep.subr.bf16.mxu1 %v4489_v38  ;;  %v4537_v13 = vld [vmem:[#allocation3 + $0x4c4] ss:$16 sps:$4 sm:$0xff]   ;;  %v4541_v21 = vld [vmem:[#allocation3 + $0x4a0] ss:$16 sps:$4 sm:$0xff]   ;;  %v4562_v38 = vld [vmem:[#allocation3 + $0x68] ss:$16 sps:$4 sm:$0xff]  }
  0x65   :  { %v124_v16 = vld [vmem:[%s5594_s0 + $0x30] sm:$0xff]  ;;  %v123_v36 = vld [vmem:[%s5594_s0 + $0x28] sm:$0xff] }
  0x66   :  { %1353 = vmatpush2.bf16.msra.mxu0 %v4491_v39  ;;  %v4543_v18 = vld [vmem:[#allocation3 + $0x4a4] ss:$16 sps:$4 sm:$0xff]   ;;  %v5425_v20 = vpack.c.bf16 %v124_v16, %v124_v16  ;;  %v4547_v25 = vld [vmem:[#allocation3 + $0x480] ss:$16 sps:$4 sm:$0xff]   ;;  %v5433_v37 = vpack.c.bf16 %v123_v36, %v123_v36  ;;  %v4651_v36 = vld [vmem:[#allocation3 + $0x26c] ss:$16 sps:$4 sm:$0xff]  }
  0x67   :  { %1394 = vmatpush2.bf16.msra.mxu1 %v4492_v40  ;;  %1354 = vmatprep.subr.bf16.mxu0 %v4493_v41  ;;  %v4549_v23 = vld [vmem:[#allocation3 + $0x484] ss:$16 sps:$4 sm:$0xff]   ;;  %v4553_v29 = vld [vmem:[#allocation3 + $0x460] ss:$16 sps:$4 sm:$0xff]   ;;  %v4570_v40 = vld [vmem:[#allocation3 + $0x4c] ss:$16 sps:$4 sm:$0xff]  }
  0x68   :  { %1395 = vmatprep.subr.bf16.mxu1 %v4495_v42  ;;  %v4555_v27 = vld [vmem:[#allocation3 + $0x464] ss:$16 sps:$4 sm:$0xff]   ;;  %v4559_v33 = vld [vmem:[#allocation3 + $0x440] ss:$16 sps:$4 sm:$0xff]   ;;  %v4568_v42 = vld [vmem:[#allocation3 + $0x48] ss:$16 sps:$4 sm:$0xff]  }
  0x69   :  { %v4561_v31 = vld [vmem:[#allocation3 + $0x444] ss:$16 sps:$4 sm:$0xff]   ;;  %v4565_v39 = vld [vmem:[#allocation3 + $0x420] ss:$16 sps:$4 sm:$0xff]  }
  0x6a   :  { %1355 = vmatpush2.bf16.msra.mxu0 %v4497_v43  ;;  %v4567_v35 = vld [vmem:[#allocation3 + $0x424] ss:$16 sps:$4 sm:$0xff]   ;;  %v4571_v43 = vld [vmem:[#allocation3 + $0x400] ss:$16 sps:$4 sm:$0xff]  }
  0x6b   :  { %1396 = vmatpush2.bf16.msra.mxu1 %v4498_v44  ;;  %1356 = vmatprep.subr.bf16.mxu0 %v4499_v45  ;;  %v4573_v41 = vld [vmem:[#allocation3 + $0x404] ss:$16 sps:$4 sm:$0xff]   ;;  %v4576_v44 = vld [vmem:[#allocation3 + $0x2c] ss:$16 sps:$4 sm:$0xff]   ;;  %v4577_v47 = vld [vmem:[#allocation3 + $0x5e0] ss:$16 sps:$4 sm:$0xff]  }
  0x6c   :  { %1397 = vmatprep.subr.bf16.mxu1 %v4501_v46  ;;  %v4579_v45 = vld [vmem:[#allocation3 + $0x5e4] ss:$16 sps:$4 sm:$0xff]   ;;  %v4574_v46 = vld [vmem:[#allocation3 + $0x28] ss:$16 sps:$4 sm:$0xff]   ;;  %v4583_v51 = vld [vmem:[#allocation3 + $0x5c0] ss:$16 sps:$4 sm:$0xff]  }
  0x6d   :  { %v4615_v6 = vld [vmem:[#allocation3 + $0x524] ss:$16 sps:$4 sm:$0xff]  }
  0x6e   :  { %1357 = vmatpush2.bf16.msra.mxu0 %v4503_v48  ;;  %v4582_v48 = vld [vmem:[#allocation3 + $0xc] ss:$16 sps:$4 sm:$0xff]  }
  0x6f   :  { %1398 = vmatpush2.bf16.msra.mxu1 %v4504_v49  ;;  %1358 = vmatprep.subr.bf16.mxu0 %v4505_v52  ;;  %v4585_v49 = vld [vmem:[#allocation3 + $0x5c4] ss:$16 sps:$4 sm:$0xff]   ;;  %v4588_v52 = vld [vmem:[#allocation3 + $0x1ec] ss:$16 sps:$4 sm:$0xff]  }
  0x70   :  { %1399 = vmatprep.subr.bf16.mxu1 %v4507_v54  ;;  %v4591_v54 = vld [vmem:[#allocation3 + $0x5a4] ss:$16 sps:$4 sm:$0xff]  }
  0x71   :  { %v122_v16 = vld [vmem:[%s5594_s0 + $0x20] sm:$0xff] }
  0x72   :  { %1359 = vmatpush2.bf16.msra.mxu0 %v4509_v55  ;;  %v4586_v55 = vld [vmem:[#allocation3 + $0x1e8] ss:$16 sps:$4 sm:$0xff]  }
  0x73   :  { %1400 = vmatpush2.bf16.msra.mxu1 %v4510_v56  ;;  %1360 = vmatprep.subr.bf16.mxu0 %v4511_v57  ;;  %v4589_v56 = vld [vmem:[#allocation3 + $0x5a0] ss:$16 sps:$4 sm:$0xff]   ;;  %v4594_v57 = vld [vmem:[#allocation3 + $0x1cc] ss:$16 sps:$4 sm:$0xff]  }
  0x74   :  { %1401 = vmatprep.subr.bf16.mxu1 %v4513_v58  ;;  %v4597_v58 = vld [vmem:[#allocation3 + $0x584] ss:$16 sps:$4 sm:$0xff]  }
  0x76   :  { %1361 = vmatpush2.bf16.msra.mxu0 %v4515_v59  ;;  %v4592_v59 = vld [vmem:[#allocation3 + $0x1c8] ss:$16 sps:$4 sm:$0xff]  }
  0x77   :  { %1402 = vmatpush2.bf16.msra.mxu1 %v4516_v60  ;;  %1362 = vmatprep.subr.bf16.mxu0 %v4517_v61  ;;  %v4595_v60 = vld [vmem:[#allocation3 + $0x580] ss:$16 sps:$4 sm:$0xff]   ;;  %v4600_v61 = vld [vmem:[#allocation3 + $0x1ac] ss:$16 sps:$4 sm:$0xff]  }
  0x78   :  { %1403 = vmatprep.subr.bf16.mxu1 %v4519_v62  ;;  %v4603_v62 = vld [vmem:[#allocation3 + $0x564] ss:$16 sps:$4 sm:$0xff]  }
  0x7a   :  { %1363 = vmatpush2.bf16.msra.mxu0 %v4521_v63  ;;  %v4598_v63 = vld [vmem:[#allocation3 + $0x1a8] ss:$16 sps:$4 sm:$0xff]  }
  0x7b   :  { %1404 = vmatpush2.bf16.msra.mxu1 %v4522_v0  ;;  %1364 = vmatprep.subr.bf16.mxu0 %v4523_v1  ;;  %v4601_v0 = vld [vmem:[#allocation3 + $0x560] ss:$16 sps:$4 sm:$0xff]   ;;  %v4606_v1 = vld [vmem:[#allocation3 + $0x18c] ss:$16 sps:$4 sm:$0xff]  }
  0x7c   :  { %1405 = vmatprep.subr.bf16.mxu1 %v4525_v2  ;;  %v4609_v2 = vld [vmem:[#allocation3 + $0x544] ss:$16 sps:$4 sm:$0xff]  }
  0x7e   :  { %1365 = vmatpush2.bf16.msra.mxu0 %v4527_v3  ;;  %v4604_v3 = vld [vmem:[#allocation3 + $0x188] ss:$16 sps:$4 sm:$0xff]  }
  0x7f   :  { %1406 = vmatpush2.bf16.msra.mxu1 %v4528_v4  ;;  %1416 = vmatprep.subr.bf16.mxu0 %v4531_v7  ;;  %v4607_v4 = vld [vmem:[#allocation3 + $0x540] ss:$16 sps:$4 sm:$0xff]   ;;  %v4610_v7 = vld [vmem:[#allocation3 + $0x168] ss:$16 sps:$4 sm:$0xff]  }
  0x80   :  { %1471 = vmatprep.subr.bf16.mxu1 %v4534_v8  ;;  %v4613_v8 = vld [vmem:[#allocation3 + $0x520] ss:$16 sps:$4 sm:$0xff]  }
  0x81   :  { %1367 = vmatmul.mubr.bf16.vlgmr.msra.gmra.mxu0 %v5415_v9 }
  0x82   :  { %1408 = vmatmul.mubr.bf16.vlgmr.msra.gmra.mxu1 %v5417_v10  ;;  %1417 = vmatpush1.bf16.msra.mxu0 %v4529_v11  ;;  %v4618_v11 = vld [vmem:[#allocation3 + $0x14c] ss:$16 sps:$4 sm:$0xff]  }
  0x83   :  { %1472 = vmatpush1.bf16.msra.mxu1 %v4532_v12  ;;  %1418 = vmatprep.subr.bf16.mxu0 %v4537_v13  ;;  %v4621_v12 = vld [vmem:[#allocation3 + $0x504] ss:$16 sps:$4 sm:$0xff]   ;;  %v4616_v13 = vld [vmem:[#allocation3 + $0x148] ss:$16 sps:$4 sm:$0xff]  }
  0x84   :  { %1489 = vmatprep.mubr.bf16.mxu1 %v5293_v17  ;;  %1498 = vmatprep.subr.bf16.mxu1 %v4540_v14  ;;  %v4619_v14 = vld [vmem:[#allocation3 + $0x500] ss:$16 sps:$4 sm:$0xff]  }
  0x85   :  { %1448 = vmatprep.mubr.bf16.mxu0 %v5433_v37 }
  0x86   :  { %1419 = vmatpush1.bf16.msra.mxu0 %v4535_v15  ;;  %v4624_v15 = vld [vmem:[#allocation3 + $0x12c] ss:$16 sps:$4 sm:$0xff]  }
  0x87   :  { %1420 = vmatprep.subr.bf16.mxu0 %v4543_v18  ;;  %v4627_v18 = vld [vmem:[#allocation3 + $0x2ec] ss:$16 sps:$4 sm:$0xff]  }
  0x8a   :  { %4099 = vmatmul.mubr.msk.bf16.vlgmr.msra.gmra.mxu1 %vm1330_vm0, %v5425_v20  ;;  %1421 = vmatpush1.bf16.msra.mxu0 %v4541_v21  ;;  %v5439_v21 = vpack.c.bf16 %v122_v16, %v122_v16  ;;  %v4714_v16 = vld [vmem:[#allocation3 + $0x54c] ss:$16 sps:$4 sm:$0xff]  }
  0x8b   :  { %1499 = vmatpush1.bf16.msra.mxu1 %v4538_v19  ;;  %1422 = vmatprep.subr.bf16.mxu0 %v4549_v23  ;;  %v4622_v19 = vld [vmem:[#allocation3 + $0x128] ss:$16 sps:$4 sm:$0xff]   ;;  %v4630_v23 = vld [vmem:[#allocation3 + $0x10c] ss:$16 sps:$4 sm:$0xff]  }
  0x8c   :  { %1500 = vmatprep.subr.bf16.mxu1 %v4546_v22  ;;  %1530 = vmatprep.mubr.bf16.mxu1 %v5400_v50  ;;  %v4580_v50 = vld [vmem:[#allocation3 + $0x8] ss:$16 sps:$4 sm:$0xff]  }
  0x8d   :  { %v4625_v22 = vld [vmem:[#allocation3 + $0x2e8] ss:$16 sps:$4 sm:$0xff]  }
  0x8e   :  { %1423 = vmatpush1.bf16.msra.mxu0 %v4547_v25  ;;  %v4628_v25 = vld [vmem:[#allocation3 + $0x108] ss:$16 sps:$4 sm:$0xff]  }
  0x8f   :  { %1501 = vmatpush1.bf16.msra.mxu1 %v4544_v24  ;;  %1424 = vmatprep.subr.bf16.mxu0 %v4555_v27  ;;  %v4633_v24 = vld [vmem:[#allocation3 + $0x2cc] ss:$16 sps:$4 sm:$0xff]  }
  0x90   :  { %1502 = vmatprep.subr.bf16.mxu1 %v4552_v26  ;;  %v4631_v26 = vld [vmem:[#allocation3 + $0x2c8] ss:$16 sps:$4 sm:$0xff]   ;;  %v4636_v27 = vld [vmem:[#allocation3 + $0x4ec] ss:$16 sps:$4 sm:$0xff]  }
  0x92   :  { %1425 = vmatpush1.bf16.msra.mxu0 %v4553_v29  ;;  %v4634_v29 = vld [vmem:[#allocation3 + $0x4e8] ss:$16 sps:$4 sm:$0xff]  }
  0x93   :  { %1503 = vmatpush1.bf16.msra.mxu1 %v4550_v28  ;;  %1426 = vmatprep.subr.bf16.mxu0 %v4561_v31  ;;  %v4639_v28 = vld [vmem:[#allocation3 + $0x2ac] ss:$16 sps:$4 sm:$0xff]  }
  0x94   :  { %1504 = vmatprep.subr.bf16.mxu1 %v4558_v30  ;;  %v4637_v30 = vld [vmem:[#allocation3 + $0x2a8] ss:$16 sps:$4 sm:$0xff]   ;;  %v4642_v31 = vld [vmem:[#allocation3 + $0x4cc] ss:$16 sps:$4 sm:$0xff]  }
  0x96   :  { %1427 = vmatpush1.bf16.msra.mxu0 %v4559_v33  ;;  %v4640_v33 = vld [vmem:[#allocation3 + $0x4c8] ss:$16 sps:$4 sm:$0xff]  }
  0x97   :  { %1505 = vmatpush1.bf16.msra.mxu1 %v4556_v32  ;;  %1428 = vmatprep.subr.bf16.mxu0 %v4567_v35  ;;  %v4645_v32 = vld [vmem:[#allocation3 + $0x28c] ss:$16 sps:$4 sm:$0xff]  }
  0x98   :  { %1506 = vmatprep.subr.bf16.mxu1 %v4564_v34  ;;  %v4643_v34 = vld [vmem:[#allocation3 + $0x288] ss:$16 sps:$4 sm:$0xff]   ;;  %v4648_v35 = vld [vmem:[#allocation3 + $0x4ac] ss:$16 sps:$4 sm:$0xff]  }
  0x9a   :  { %1429 = vmatpush1.bf16.msra.mxu0 %v4565_v39  ;;  %v4649_v39 = vld [vmem:[#allocation3 + $0x268] ss:$16 sps:$4 sm:$0xff]  }
  0x9b   :  { %1507 = vmatpush1.bf16.msra.mxu1 %v4562_v38  ;;  %1430 = vmatprep.subr.bf16.mxu0 %v4573_v41  ;;  %v4646_v38 = vld [vmem:[#allocation3 + $0x4a8] ss:$16 sps:$4 sm:$0xff]  }
  0x9c   :  { %1508 = vmatprep.subr.bf16.mxu1 %v4570_v40  ;;  %v4657_v40 = vld [vmem:[#allocation3 + $0x24c] ss:$16 sps:$4 sm:$0xff]   ;;  %v4652_v41 = vld [vmem:[#allocation3 + $0x488] ss:$16 sps:$4 sm:$0xff]  }
  0x9e   :  { %1431 = vmatpush1.bf16.msra.mxu0 %v4571_v43  ;;  %v4663_v43 = vld [vmem:[#allocation3 + $0x22c] ss:$16 sps:$4 sm:$0xff]  }
  0x9f   :  { %1509 = vmatpush1.bf16.msra.mxu1 %v4568_v42  ;;  %1432 = vmatprep.subr.bf16.mxu0 %v4579_v45  ;;  %v4660_v42 = vld [vmem:[#allocation3 + $0x46c] ss:$16 sps:$4 sm:$0xff]   ;;  %v4661_v45 = vld [vmem:[#allocation3 + $0x228] ss:$16 sps:$4 sm:$0xff]  }
  0xa0   :  { %1510 = vmatprep.subr.bf16.mxu1 %v4576_v44  ;;  %v4658_v44 = vld [vmem:[#allocation3 + $0x468] ss:$16 sps:$4 sm:$0xff]  }
  0xa2   :  { %1433 = vmatpush2.bf16.msra.mxu0 %v4577_v47  ;;  %v4669_v47 = vld [vmem:[#allocation3 + $0x20c] ss:$16 sps:$4 sm:$0xff]  }
  0xa3   :  { %1511 = vmatpush1.bf16.msra.mxu1 %v4574_v46  ;;  %1434 = vmatprep.subr.bf16.mxu0 %v4585_v49  ;;  %v4666_v46 = vld [vmem:[#allocation3 + $0x44c] ss:$16 sps:$4 sm:$0xff]  }
  0xa4   :  { %1512 = vmatprep.subr.bf16.mxu1 %v4582_v48  ;;  %v4667_v48 = vld [vmem:[#allocation3 + $0x208] ss:$16 sps:$4 sm:$0xff]   ;;  %v4672_v49 = vld [vmem:[#allocation3 + $0x42c] ss:$16 sps:$4 sm:$0xff]  }
  0xa6   :  { %1435 = vmatpush2.bf16.msra.mxu0 %v4583_v51  ;;  %v4670_v51 = vld [vmem:[#allocation3 + $0x428] ss:$16 sps:$4 sm:$0xff]  }
  0xa7   :  { %1513 = vmatpush1.bf16.msra.mxu1 %v4580_v50  ;;  %1436 = vmatprep.subr.bf16.mxu0 %v4591_v54  ;;  %v4675_v50 = vld [vmem:[#allocation3 + $0x3ec] ss:$16 sps:$4 sm:$0xff]  }
  0xa8   :  { %1514 = vmatprep.subr.bf16.mxu1 %v4588_v52  ;;  %v4673_v52 = vld [vmem:[#allocation3 + $0x3e8] ss:$16 sps:$4 sm:$0xff]   ;;  %v4678_v54 = vld [vmem:[#allocation3 + $0x40c] ss:$16 sps:$4 sm:$0xff]  }
  0xaa   :  { %1437 = vmatpush2.bf16.msra.mxu0 %v4589_v56  ;;  %v4676_v56 = vld [vmem:[#allocation3 + $0x408] ss:$16 sps:$4 sm:$0xff]  }
  0xab   :  { %1515 = vmatpush2.bf16.msra.mxu1 %v4586_v55  ;;  %1438 = vmatprep.subr.bf16.mxu0 %v4597_v58  ;;  %v4681_v55 = vld [vmem:[#allocation3 + $0x3cc] ss:$16 sps:$4 sm:$0xff]  }
  0xac   :  { %1516 = vmatprep.subr.bf16.mxu1 %v4594_v57  ;;  %v4679_v57 = vld [vmem:[#allocation3 + $0x3c8] ss:$16 sps:$4 sm:$0xff]   ;;  %v4684_v58 = vld [vmem:[#allocation3 + $0x5ec] ss:$16 sps:$4 sm:$0xff]  }
  0xae   :  { %1439 = vmatpush2.bf16.msra.mxu0 %v4595_v60  ;;  %v4682_v60 = vld [vmem:[#allocation3 + $0x5e8] ss:$16 sps:$4 sm:$0xff]  }
  0xaf   :  { %1517 = vmatpush2.bf16.msra.mxu1 %v4592_v59  ;;  %1440 = vmatprep.subr.bf16.mxu0 %v4603_v62  ;;  %v4687_v59 = vld [vmem:[#allocation3 + $0x3ac] ss:$16 sps:$4 sm:$0xff]  }
  0xb0   :  { %1518 = vmatprep.subr.bf16.mxu1 %v4600_v61  ;;  %v4685_v61 = vld [vmem:[#allocation3 + $0x3a8] ss:$16 sps:$4 sm:$0xff]   ;;  %v4690_v62 = vld [vmem:[#allocation3 + $0x5cc] ss:$16 sps:$4 sm:$0xff]  }
  0xb2   :  { %1441 = vmatpush2.bf16.msra.mxu0 %v4601_v0  ;;  %v4688_v0 = vld [vmem:[#allocation3 + $0x5c8] ss:$16 sps:$4 sm:$0xff]  }
  0xb3   :  { %1519 = vmatpush2.bf16.msra.mxu1 %v4598_v63  ;;  %1442 = vmatprep.subr.bf16.mxu0 %v4609_v2  ;;  %v4693_v63 = vld [vmem:[#allocation3 + $0x38c] ss:$16 sps:$4 sm:$0xff]  }
  0xb4   :  { %1520 = vmatprep.subr.bf16.mxu1 %v4606_v1  ;;  %v4691_v1 = vld [vmem:[#allocation3 + $0x388] ss:$16 sps:$4 sm:$0xff]   ;;  %v4696_v2 = vld [vmem:[#allocation3 + $0x5ac] ss:$16 sps:$4 sm:$0xff]  }
  0xb6   :  { %1443 = vmatpush2.bf16.msra.mxu0 %v4607_v4  ;;  %v4694_v4 = vld [vmem:[#allocation3 + $0x5a8] ss:$16 sps:$4 sm:$0xff]  }
  0xb7   :  { %1521 = vmatpush2.bf16.msra.mxu1 %v4604_v3  ;;  %1444 = vmatprep.subr.bf16.mxu0 %v4615_v6  ;;  %v4699_v3 = vld [vmem:[#allocation3 + $0x36c] ss:$16 sps:$4 sm:$0xff]  }
  0xb8   :  { %1522 = vmatprep.subr.bf16.mxu1 %v4612_v5  ;;  %v4697_v5 = vld [vmem:[#allocation3 + $0x368] ss:$16 sps:$4 sm:$0xff]   ;;  %v4702_v6 = vld [vmem:[#allocation3 + $0x58c] ss:$16 sps:$4 sm:$0xff]  }
  0xba   :  { %1445 = vmatpush2.bf16.msra.mxu0 %v4613_v8  ;;  %v4700_v8 = vld [vmem:[#allocation3 + $0x588] ss:$16 sps:$4 sm:$0xff]  }
  0xbb   :  { %1523 = vmatpush2.bf16.msra.mxu1 %v4610_v7  ;;  %1446 = vmatprep.subr.bf16.mxu0 %v4621_v12  ;;  %v4705_v7 = vld [vmem:[#allocation3 + $0x34c] ss:$16 sps:$4 sm:$0xff]  }
  0xbc   :  { %1524 = vmatprep.subr.bf16.mxu1 %v4618_v11  ;;  %v4703_v11 = vld [vmem:[#allocation3 + $0x348] ss:$16 sps:$4 sm:$0xff]   ;;  %v4708_v12 = vld [vmem:[#allocation3 + $0x56c] ss:$16 sps:$4 sm:$0xff]  }
  0xbe   :  { %1447 = vmatpush2.bf16.msra.mxu0 %v4619_v14  ;;  %v4706_v14 = vld [vmem:[#allocation3 + $0x568] ss:$16 sps:$4 sm:$0xff]  }
  0xbf   :  { %1525 = vmatpush2.bf16.msra.mxu1 %v4616_v13  ;;  %1539 = vmatprep.subr.bf16.mxu0 %v4627_v18  ;;  %v4711_v13 = vld [vmem:[#allocation3 + $0x32c] ss:$16 sps:$4 sm:$0xff]  }
  0xc0   :  { %1526 = vmatprep.subr.bf16.mxu1 %v4624_v15  ;;  %v4709_v15 = vld [vmem:[#allocation3 + $0x328] ss:$16 sps:$4 sm:$0xff]   ;;  %v4717_v18 = vld [vmem:[#allocation3 + $0x30c] ss:$16 sps:$4 sm:$0xff]  }
  0xc1   :  { %1449 = vmatmul.mubr.bf16.vlgmr.msra.gmra.mxu0 %v5439_v21 }
  0xc2   :  { %1540 = vmatpush1.bf16.msra.mxu0 %v4625_v22  ;;  %1571 = vmatprep.mubr.bf16.mxu0 %v5405_v53  ;;  %v4654_v53 = vld [vmem:[#allocation3 + $0x48c] ss:$16 sps:$4 sm:$0xff]   ;;  %v4715_v22 = vld [vmem:[#allocation3 + $0x308] ss:$16 sps:$4 sm:$0xff]  }
  0xc3   :  { %1527 = vmatpush2.bf16.msra.mxu1 %v4622_v19  ;;  %1541 = vmatprep.subr.bf16.mxu0 %v4633_v24  ;;  %v4712_v19 = vld [vmem:[#allocation3 + $0x548] ss:$16 sps:$4 sm:$0xff]   ;;  %v4729_v24 = vld [vmem:[#allocation6 + $0xe4] ss:$16 sps:$4 sm:$0xff]  }
  0xc4   :  { %1528 = vmatprep.subr.bf16.mxu1 %v4630_v23  ;;  %v4720_v23 = vld [vmem:[#allocation3 + $0x52c] ss:$16 sps:$4 sm:$0xff]  }
  0xc6   :  { %1542 = vmatpush1.bf16.msra.mxu0 %v4631_v26  ;;  %v4727_v26 = vld [vmem:[#allocation6 + $0xe0] ss:$16 sps:$4 sm:$0xff]  }
  0xc7   :  { %1529 = vmatpush2.bf16.msra.mxu1 %v4628_v25  ;;  %1543 = vmatprep.subr.bf16.mxu0 %v4639_v28  ;;  %v4718_v25 = vld [vmem:[#allocation3 + $0x528] ss:$16 sps:$4 sm:$0xff]   ;;  %v4732_v28 = vld [vmem:[#allocation6 + $0xc4] ss:$16 sps:$4 sm:$0xff]  }
  0xc8   :  { %1580 = vmatprep.subr.bf16.mxu1 %v4636_v27  ;;  %v4723_v27 = vld [vmem:[#allocation3 + $0x50c] ss:$16 sps:$4 sm:$0xff]  }
  0xca   :  { %1531 = vmatmul.mubr.bf16.vlgmr.msra.gmra.mxu1 %v5415_v9  ;;  %1544 = vmatpush1.bf16.msra.mxu0 %v4637_v30  ;;  %v4655_v9 = vld [vmem:[#allocation3 + $0x248] ss:$16 sps:$4 sm:$0xff]   ;;  %v4730_v30 = vld [vmem:[#allocation6 + $0xc0] ss:$16 sps:$4 sm:$0xff]  }
  0xcb   :  { %1581 = vmatpush1.bf16.msra.mxu1 %v4634_v29  ;;  %1545 = vmatprep.subr.bf16.mxu0 %v4645_v32  ;;  %v4721_v29 = vld [vmem:[#allocation3 + $0x508] ss:$16 sps:$4 sm:$0xff]   ;;  %v4735_v32 = vld [vmem:[#allocation6 + $0xa4] ss:$16 sps:$4 sm:$0xff]  }
  0xcc   :  { %1582 = vmatprep.subr.bf16.mxu1 %v4642_v31  ;;  %1612 = vmatprep.mubr.bf16.mxu1 %v5433_v37  ;;  %v4664_v37 = vld [vmem:[#allocation3 + $0x448] ss:$16 sps:$4 sm:$0xff]   ;;  %v4726_v31 = vld [vmem:[#allocation3 + $0x60c] ss:$16 sps:$4 sm:$0xff]  }
  0xce   :  { %1546 = vmatpush1.bf16.msra.mxu0 %v4643_v34  ;;  %v4733_v34 = vld [vmem:[#allocation6 + $0xa0] ss:$16 sps:$4 sm:$0xff]  }
  0xcf   :  { %1583 = vmatpush1.bf16.msra.mxu1 %v4640_v33  ;;  %1547 = vmatprep.subr.bf16.mxu0 %v4651_v36  ;;  %v4724_v33 = vld [vmem:[#allocation3 + $0x608] ss:$16 sps:$4 sm:$0xff]   ;;  %v4736_v36 = vld [vmem:[#allocation6 + $0x80] ss:$16 sps:$4 sm:$0xff]  }
  0xd0   :  { %1584 = vmatprep.subr.bf16.mxu1 %v4648_v35  ;;  %v4738_v35 = vld [vmem:[#allocation6 + $0x84] ss:$16 sps:$4 sm:$0xff]  }
  0xd2   :  { %1548 = vmatpush1.bf16.msra.mxu0 %v4649_v39  ;;  %v4744_v39 = vld [vmem:[#allocation6 + $0x44] ss:$16 sps:$4 sm:$0xff]  }
  0xd3   :  { %1585 = vmatpush1.bf16.msra.mxu1 %v4646_v38  ;;  %1549 = vmatprep.subr.bf16.mxu0 %v4657_v40  ;;  %v4739_v38 = vld [vmem:[#allocation6 + $0x60] ss:$16 sps:$4 sm:$0xff]   ;;  %v4747_v40 = vld [vmem:[#allocation6 + $0x24] ss:$16 sps:$4 sm:$0xff]  }
  0xd4   :  { %1586 = vmatprep.subr.bf16.mxu1 %v4654_v53  ;;  %v4742_v53 = vld [vmem:[#allocation6 + $0x40] ss:$16 sps:$4 sm:$0xff]  }
  0xd6   :  { %1550 = vmatpush1.bf16.msra.mxu0 %v4655_v9  ;;  %v4748_v9 = vld [vmem:[#allocation6] ss:$16 sps:$4 sm:$0xff]  }
  0xd7   :  { %1587 = vmatpush1.bf16.msra.mxu1 %v4652_v41  ;;  %1551 = vmatprep.subr.bf16.mxu0 %v4663_v43  ;;  %v4745_v41 = vld [vmem:[#allocation6 + $0x20] ss:$16 sps:$4 sm:$0xff]   ;;  %v4756_v43 = vld [vmem:[#allocation6 + $0x1c4] ss:$16 sps:$4 sm:$0xff]  }
  0xd8   :  { %1588 = vmatprep.subr.bf16.mxu1 %v4660_v42  ;;  %v4751_v42 = vld [vmem:[#allocation6 + $0x1e0] ss:$16 sps:$4 sm:$0xff]  }
  0xda   :  { %1552 = vmatpush1.bf16.msra.mxu0 %v4661_v45  ;;  %v4759_v45 = vld [vmem:[#allocation6 + $0x1a4] ss:$16 sps:$4 sm:$0xff]  }
  0xdb   :  { %1589 = vmatpush1.bf16.msra.mxu1 %v4658_v44  ;;  %1553 = vmatprep.subr.bf16.mxu0 %v4669_v47  ;;  %v4754_v44 = vld [vmem:[#allocation6 + $0x1c0] ss:$16 sps:$4 sm:$0xff]  }
  0xdc   :  { %1590 = vmatprep.subr.bf16.mxu1 %v4666_v46  ;;  %v4762_v46 = vld [vmem:[#allocation6 + $0x184] ss:$16 sps:$4 sm:$0xff]   ;;  %v4787_v47 = vld [vmem:[#allocation6 + $0x2e0] ss:$16 sps:$4 sm:$0xff]  }
  0xde   :  { %1554 = vmatpush1.bf16.msra.mxu0 %v4667_v48  ;;  %v4760_v48 = vld [vmem:[#allocation6 + $0x180] ss:$16 sps:$4 sm:$0xff]  }
  0xdf   :  { %1591 = vmatpush1.bf16.msra.mxu1 %v4664_v37  ;;  %1555 = vmatprep.subr.bf16.mxu0 %v4675_v50  ;;  %v4789_v37 = vld [vmem:[#allocation6 + $0x2e4] ss:$16 sps:$4 sm:$0xff]   ;;  %v4793_v50 = vld [vmem:[#allocation6 + $0x2c0] ss:$16 sps:$4 sm:$0xff]  }
  0xe0   :  { %1592 = vmatprep.subr.bf16.mxu1 %v4672_v49  ;;  %v4765_v49 = vld [vmem:[#allocation6 + $0x164] ss:$16 sps:$4 sm:$0xff]  }
  0xe2   :  { %1556 = vmatpush2.bf16.msra.mxu0 %v4673_v52  ;;  %v4763_v52 = vld [vmem:[#allocation6 + $0x160] ss:$16 sps:$4 sm:$0xff]  }
  0xe3   :  { %1593 = vmatpush1.bf16.msra.mxu1 %v4670_v51  ;;  %1557 = vmatprep.subr.bf16.mxu0 %v4681_v55  ;;  %v4795_v51 = vld [vmem:[#allocation6 + $0x2c4] ss:$16 sps:$4 sm:$0xff]   ;;  %v4799_v55 = vld [vmem:[#allocation6 + $0x2a0] ss:$16 sps:$4 sm:$0xff]  }
  0xe4   :  { %1594 = vmatprep.subr.bf16.mxu1 %v4678_v54  ;;  %v4768_v54 = vld [vmem:[#allocation6 + $0x144] ss:$16 sps:$4 sm:$0xff]  }
  0xe6   :  { %1558 = vmatpush2.bf16.msra.mxu0 %v4679_v57  ;;  %v4766_v57 = vld [vmem:[#allocation6 + $0x140] ss:$16 sps:$4 sm:$0xff]  }
  0xe7   :  { %1595 = vmatpush1.bf16.msra.mxu1 %v4676_v56  ;;  %1559 = vmatprep.subr.bf16.mxu0 %v4687_v59  ;;  %v4801_v56 = vld [vmem:[#allocation6 + $0x2a4] ss:$16 sps:$4 sm:$0xff]   ;;  %v4805_v59 = vld [vmem:[#allocation6 + $0x280] ss:$16 sps:$4 sm:$0xff]  }
  0xe8   :  { %1596 = vmatprep.subr.bf16.mxu1 %v4684_v58  ;;  %v4771_v58 = vld [vmem:[#allocation6 + $0x124] ss:$16 sps:$4 sm:$0xff]  }
  0xea   :  { %1560 = vmatpush2.bf16.msra.mxu0 %v4685_v61  ;;  %v4769_v61 = vld [vmem:[#allocation6 + $0x120] ss:$16 sps:$4 sm:$0xff]  }
  0xeb   :  { %1597 = vmatpush2.bf16.msra.mxu1 %v4682_v60  ;;  %1561 = vmatprep.subr.bf16.mxu0 %v4693_v63  ;;  %v4807_v60 = vld [vmem:[#allocation6 + $0x284] ss:$16 sps:$4 sm:$0xff]   ;;  %v4811_v63 = vld [vmem:[#allocation6 + $0x260] ss:$16 sps:$4 sm:$0xff]  }
  0xec   :  { %1598 = vmatprep.subr.bf16.mxu1 %v4690_v62  ;;  %v4774_v62 = vld [vmem:[#allocation6 + $0x104] ss:$16 sps:$4 sm:$0xff]  }
  0xee   :  { %1562 = vmatpush2.bf16.msra.mxu0 %v4691_v1  ;;  %v4772_v1 = vld [vmem:[#allocation6 + $0x100] ss:$16 sps:$4 sm:$0xff]  }
  0xef   :  { %1599 = vmatpush2.bf16.msra.mxu1 %v4688_v0  ;;  %1563 = vmatprep.subr.bf16.mxu0 %v4699_v3  ;;  %v4813_v0 = vld [vmem:[#allocation6 + $0x264] ss:$16 sps:$4 sm:$0xff]   ;;  %v4817_v3 = vld [vmem:[#allocation6 + $0x240] ss:$16 sps:$4 sm:$0xff]  }
  0xf0   :  { %1600 = vmatprep.subr.bf16.mxu1 %v4696_v2  ;;  %v4777_v2 = vld [vmem:[#allocation6 + $0xec] ss:$16 sps:$4 sm:$0xff]  }
  0xf2   :  { %1564 = vmatpush2.bf16.msra.mxu0 %v4697_v5 }
  0xf3   :  { %1601 = vmatpush2.bf16.msra.mxu1 %v4694_v4  ;;  %1565 = vmatprep.subr.bf16.mxu0 %v4705_v7  ;;  %v4819_v4 = vld [vmem:[#allocation6 + $0x244] ss:$16 sps:$4 sm:$0xff]  }
  0xf4   :  { %1602 = vmatprep.subr.bf16.mxu1 %v4702_v6  ;;  %v4825_v7 = vld [vmem:[#allocation6 + $0x224] ss:$16 sps:$4 sm:$0xff]  }
  0xf6   :  { %1566 = vmatpush2.bf16.msra.mxu0 %v4703_v11 }
  0xf7   :  { %1603 = vmatpush2.bf16.msra.mxu1 %v4700_v8  ;;  %1567 = vmatprep.subr.bf16.mxu0 %v4711_v13  ;;  %v4823_v8 = vld [vmem:[#allocation6 + $0x220] ss:$16 sps:$4 sm:$0xff]  }
  0xf8   :  { %1604 = vmatprep.subr.bf16.mxu1 %v4708_v12  ;;  %v4829_v13 = vld [vmem:[#allocation6 + $0x200] ss:$16 sps:$4 sm:$0xff]  }
  0xfa   :  { %1568 = vmatpush2.bf16.msra.mxu0 %v4709_v15 }
  0xfb   :  { %1605 = vmatpush2.bf16.msra.mxu1 %v4706_v14  ;;  %1569 = vmatprep.subr.bf16.mxu0 %v4717_v18 }
  0xfc   :  { %1606 = vmatprep.subr.bf16.mxu1 %v4714_v16  ;;  %v4831_v16 = vld [vmem:[#allocation6 + $0x204] ss:$16 sps:$4 sm:$0xff]  }
  0xfe   :  { %1570 = vmatpush2.bf16.msra.mxu0 %v4715_v22  ;;  %v1810_v22 = vld [vmem:[#allocation6 + $0x3e0] sm:$0x33] }
  0xff   :  { %1607 = vmatpush2.bf16.msra.mxu1 %v4712_v19  ;;  %2481 = vmatprep.subr.bf16.mxu0 %v4729_v24  ;;  %v4230_v24 = vcombine.high %v1810_v22, %v1810_v22 }
 0x100   :  { %1608 = vmatprep.subr.bf16.mxu1 %v4720_v23 }
 0x101   :  { %1572 = vmatmul.mubr.bf16.vlgmr.msra.gmra.mxu0 %v5417_v10  ;;  %v4741_v10 = vld [vmem:[#allocation6 + $0x64] ss:$16 sps:$4 sm:$0xff]  }
 0x102   :  { %2482 = vmatpush1.bf16.msra.mxu0 %v4727_v26 }
 0x103   :  { %1609 = vmatpush2.bf16.msra.mxu1 %v4718_v25  ;;  %2483 = vmatprep.subr.bf16.mxu0 %v4732_v28  ;;  %v4229_v25 = vcombine.low %v1810_v22, %v1810_v22  ;;  %v4790_v22 = vld [vmem:[#allocation6 + $0x68] ss:$16 sps:$4 sm:$0xff]  }
 0x104   :  { %1610 = vmatprep.subr.bf16.mxu1 %v4723_v27 }
 0x105   :  { %v2470_v27 = vsel %vm2468_vm1, %v4229_v25, 0  ;;  %v4804_v25 = vld [vmem:[#allocation6 + $0x2c] ss:$16 sps:$4 sm:$0xff]  }
 0x106   :  { %2484 = vmatpush1.bf16.msra.mxu0 %v4730_v30  ;;  %v4840_v30 = vld [vmem:[#allocation6 + $0x3c0] ss:$16 sps:$4 sm:$0xff]  }
 0x107   :  { %1611 = vmatpush2.bf16.msra.mxu1 %v4721_v29  ;;  %2485 = vmatprep.subr.bf16.mxu0 %v4735_v32  ;;  %v4842_v29 = vld [vmem:[#allocation6 + $0x3c4] ss:$16 sps:$4 sm:$0xff]  }
 0x108   :  { %1635 = vmatprep.subr.bf16.mxu1 %v4726_v31  ;;  %v4848_v32 = vld [vmem:[#allocation6 + $0x3a4] ss:$16 sps:$4 sm:$0xff]  }
 0x10a   :  { %1613 = vmatmul.mubr.bf16.vlgmr.msra.gmra.mxu1 %v5439_v21  ;;  %2486 = vmatpush1.bf16.msra.mxu0 %v4733_v34  ;;  %v4750_v21 = vld [vmem:[#allocation6 + $0x4] ss:$16 sps:$4 sm:$0xff]  }
 0x10b   :  { %1636 = vmatpush1.bf16.msra.mxu1 %v4724_v33  ;;  %1653 = vmatprep.mubr.bf16.mxu1 %v5293_v17  ;;  %v4753_v17 = vld [vmem:[#allocation6 + $0x1e4] ss:$16 sps:$4 sm:$0xff]   ;;  %v4846_v33 = vld [vmem:[#allocation6 + $0x3a0] ss:$16 sps:$4 sm:$0xff]  }
 0x10c   :  { %2487 = vmatprep.subr.bf16.mxu0 %v4738_v35  ;;  %2522 = vmatprep.subr.bf16.mxu1 %v4789_v37  ;;  %v4854_v34 = vld [vmem:[#allocation6 + $0x384] ss:$16 sps:$4 sm:$0xff]   ;;  %v4852_v35 = vld [vmem:[#allocation6 + $0x380] ss:$16 sps:$4 sm:$0xff]  }
 0x10e   :  { %2488 = vmatpush1.bf16.msra.mxu0 %v4736_v36  ;;  %v4860_v36 = vld [vmem:[#allocation6 + $0x364] ss:$16 sps:$4 sm:$0xff]  }
 0x10f   :  { %2489 = vmatprep.subr.bf16.mxu0 %v4741_v10  ;;  %v4858_v10 = vld [vmem:[#allocation6 + $0x360] ss:$16 sps:$4 sm:$0xff]  }
 0x112   :  { %4100 = vmatmul.mubr.msk.bf16.vlgmr.msra.gmra.mxu1 %vm1330_vm0, %v5425_v20  ;;  %2490 = vmatpush1.bf16.msra.mxu0 %v4739_v38  ;;  %v4757_v20 = vld [vmem:[#allocation6 + $0x1a0] ss:$16 sps:$4 sm:$0xff]   ;;  %v4863_v38 = vld [vmem:[#allocation6 + $0x344] ss:$16 sps:$4 sm:$0xff]  }
 0x113   :  { %2491 = vmatprep.subr.bf16.mxu0 %v4744_v39  ;;  %2523 = vmatpush1.bf16.msra.mxu1 %v4787_v47  ;;  %v4861_v39 = vld [vmem:[#allocation6 + $0x340] ss:$16 sps:$4 sm:$0xff]  }
 0x114   :  { %2524 = vmatprep.subr.bf16.mxu1 %v4795_v51 }
 0x116   :  { %2492 = vmatpush1.bf16.msra.mxu0 %v4742_v53  ;;  %v4866_v53 = vld [vmem:[#allocation6 + $0x324] ss:$16 sps:$4 sm:$0xff]  }
 0x117   :  { %2493 = vmatprep.subr.bf16.mxu0 %v4747_v40  ;;  %2525 = vmatpush1.bf16.msra.mxu1 %v4793_v50  ;;  %v4864_v40 = vld [vmem:[#allocation6 + $0x320] ss:$16 sps:$4 sm:$0xff]  }
 0x118   :  { %2526 = vmatprep.subr.bf16.mxu1 %v4801_v56 }
 0x11a   :  { %2494 = vmatpush1.bf16.msra.mxu0 %v4745_v41  ;;  %v4869_v41 = vld [vmem:[#allocation6 + $0x304] ss:$16 sps:$4 sm:$0xff]  }
 0x11b   :  { %2495 = vmatprep.subr.bf16.mxu0 %v4750_v21  ;;  %2527 = vmatpush1.bf16.msra.mxu1 %v4799_v55  ;;  %v4867_v21 = vld [vmem:[#allocation6 + $0x300] ss:$16 sps:$4 sm:$0xff]  }
 0x11c   :  { %2528 = vmatprep.subr.bf16.mxu1 %v4807_v60 }
 0x11e   :  { %2496 = vmatpush1.bf16.msra.mxu0 %v4748_v9  ;;  %v4872_v9 = vld [vmem:[#allocation6 + $0x2ec] ss:$16 sps:$4 sm:$0xff]  }
 0x11f   :  { %2497 = vmatprep.subr.bf16.mxu0 %v4753_v17  ;;  %2529 = vmatpush1.bf16.msra.mxu1 %v4805_v59  ;;  %v330_v17 = vlaneseq }
 0x120   :  { %2530 = vmatprep.subr.bf16.mxu1 %v4813_v0 }
 0x122   :  { %2498 = vmatpush2.bf16.msra.mxu0 %v4751_v42  ;;  %v5458_v42 = vshrl.u32 %v330_v17, 7 }
 0x123   :  { %2499 = vmatprep.subr.bf16.mxu0 %v4756_v43  ;;  %2531 = vmatpush1.bf16.msra.mxu1 %v4811_v63 }
 0x124   :  { %2532 = vmatprep.subr.bf16.mxu1 %v4819_v4  ;;  %v5461_v43 = vsub.s32 0, %v5458_v42 }
 0x126   :  { %2500 = vmatpush2.bf16.msra.mxu0 %v4754_v44  ;;  %v5466_v44 = vld [vmem:[%s5596_s2] sm:$0xf] }
 0x127   :  { %2501 = vmatprep.subr.bf16.mxu0 %v4759_v45  ;;  %2533 = vmatpush1.bf16.msra.mxu1 %v4817_v3  ;;  %v5469_v45 = vsub.s32 1, %v5458_v42 }
 0x128   :  { %2534 = vmatprep.subr.bf16.mxu1 %v4825_v7 }
 0x12a   :  { %2502 = vmatpush2.bf16.msra.mxu0 %v4757_v20  ;;  %v333_v20 = vrot.slane %v5466_v44, %v5461_v43 }
 0x12b   :  { %2503 = vmatprep.subr.bf16.mxu0 %v4762_v46  ;;  %2535 = vmatpush1.bf16.msra.mxu1 %v4823_v8  ;;  %v337_v46 = vrot.slane %v5466_v44, %v5469_v45  ;;  %v4775_v8 = vld [vmem:[#allocation6 + $0xe8] ss:$16 sps:$4 sm:$0xff]  }
 0x12c   :  { %2536 = vmatprep.subr.bf16.mxu1 %v4831_v16  ;;  %v4786_v16 = vld [vmem:[#allocation6 + $0x8c] ss:$16 sps:$4 sm:$0xff]  }
 0x12e   :  { %2504 = vmatpush2.bf16.msra.mxu0 %v4760_v48 }
 0x12f   :  { %2505 = vmatprep.subr.bf16.mxu0 %v4765_v49  ;;  %2537 = vmatpush1.bf16.msra.mxu1 %v4829_v13  ;;  %v4778_v13 = vld [vmem:[#allocation6 + $0xc8] ss:$16 sps:$4 sm:$0xff]  }
 0x130   :  { %4233 = vmatprep.subr.msk.bf16.mxu1 %vm2468_vm1, %v4230_v24  ;;  %v4796_v24 = vld [vmem:[#allocation6 + $0x48] ss:$16 sps:$4 sm:$0xff]  }
 0x132   :  { %2506 = vmatpush2.bf16.msra.mxu0 %v4763_v52 }
 0x133   :  { %2507 = vmatprep.subr.bf16.mxu0 %v4768_v54  ;;  %2539 = vmatpush2.bf16.msra.mxu1 %v2470_v27  ;;  %v4810_v27 = vld [vmem:[#allocation6 + $0xc] ss:$16 sps:$4 sm:$0xff]  }
 0x134   :  { %2540 = vmatprep.subr.bf16.mxu1 %v4842_v29  ;;  %v4816_v29 = vld [vmem:[#allocation6 + $0x1ec] ss:$16 sps:$4 sm:$0xff]  }
 0x136   :  { %2508 = vmatpush2.bf16.msra.mxu0 %v4766_v57 }
 0x137   :  { %2509 = vmatprep.subr.bf16.mxu0 %v4771_v58  ;;  %2541 = vmatpush2.bf16.msra.mxu1 %v4840_v30  ;;  %v4814_v30 = vld [vmem:[#allocation6 + $0x1e8] ss:$16 sps:$4 sm:$0xff]  }
 0x138   :  { %2542 = vmatprep.subr.bf16.mxu1 %v4848_v32  ;;  %v4820_v32 = vld [vmem:[#allocation6 + $0x1c8] ss:$16 sps:$4 sm:$0xff]  }
 0x13a   :  { %2510 = vmatpush2.bf16.msra.mxu0 %v4769_v61 }
 0x13b   :  { %2511 = vmatprep.subr.bf16.mxu0 %v4774_v62  ;;  %2543 = vmatpush2.bf16.msra.mxu1 %v4846_v33  ;;  %v4828_v33 = vld [vmem:[#allocation6 + $0x1ac] ss:$16 sps:$4 sm:$0xff]  }
 0x13c   :  { %2544 = vmatprep.subr.bf16.mxu1 %v4854_v34 }
 0x13e   :  { %2512 = vmatpush2.bf16.msra.mxu0 %v4772_v1 }
 0x13f   :  { %2563 = vmatprep.subr.bf16.mxu0 %v4777_v2  ;;  %2545 = vmatpush2.bf16.msra.mxu1 %v4852_v35 }
 0x140   :  { %2546 = vmatprep.subr.bf16.mxu1 %v4860_v36  ;;  %v4826_v36 = vld [vmem:[#allocation6 + $0x1a8] ss:$16 sps:$4 sm:$0xff]  }
 0x141   :  { %v5450_v5 = vpop.f32.mrf.mxu0 }
 0x142   :  { %v5452_v6 = vpop.f32.mrf.mxu1  ;;  %v1369_v47 = vadd.f32 %v5450_v5, %v333_v20 }
 0x143   :  { %v1370_v11 = vpop.f32.mrf.mxu0  ;;  %2547 = vmatpush2.bf16.msra.mxu1 %v4858_v10  ;;  %v340_v10 = vsub.s32 2, %v5458_v42 }
 0x144   :  { %v5454_v12 = vpop.f32.mrf.mxu1  ;;  %2548 = vmatprep.subr.bf16.mxu1 %v4863_v38  ;;  %v1371_v37 = vadd.f32 %v1370_v11, %v337_v46  ;;  %v1410_v48 = vadd.f32 %v5452_v6, %v1369_v47  ;;  %v4834_v38 = vld [vmem:[#allocation6 + $0x18c] ss:$16 sps:$4 sm:$0xff]   ;;  %v4837_v47 = vld [vmem:[#allocation6 + $0x168] ss:$16 sps:$4 sm:$0xff]  }
 0x145   :  { %v1372_v15 = vpop.f32.mrf.mxu0 }
 0x146   :  { %v1413_v14 = vpop.f32.mrf.mxu1  ;;  %v1412_v50 = vadd.f32 %v5454_v12, %v1371_v37  ;;  %v4780_v12 = vld [vmem:[#allocation6 + $0xcc] ss:$16 sps:$4 sm:$0xff]   ;;  %v4781_v15 = vld [vmem:[#allocation6 + $0xa8] ss:$16 sps:$4 sm:$0xff]  }
 0x147   :  { %v1373_v19 = vpop.f32.mrf.mxu0  ;;  %2549 = vmatpush2.bf16.msra.mxu1 %v4861_v39  ;;  %v4783_v14 = vld [vmem:[#allocation6 + $0xac] ss:$16 sps:$4 sm:$0xff]  }
 0x148   :  { %v1414_v18 = vpop.f32.mrf.mxu1  ;;  %2550 = vmatprep.subr.bf16.mxu1 %v4866_v53  ;;  %v4792_v19 = vld [vmem:[#allocation6 + $0x6c] ss:$16 sps:$4 sm:$0xff]   ;;  %v344_v53 = vsub.s32 3, %v5458_v42 }
 0x149   :  { %v4784_v18 = vld [vmem:[#allocation6 + $0x88] ss:$16 sps:$4 sm:$0xff]  }
 0x14a   :  { %v1491_v23 = vpop.f32.mrf.mxu1  ;;  %v345_v20 = vrot.slane %v5466_v44, %v344_v53 }
 0x14b   :  { %2551 = vmatpush2.bf16.msra.mxu1 %v4864_v40  ;;  %v4832_v40 = vld [vmem:[#allocation6 + $0x188] ss:$16 sps:$4 sm:$0xff]  }
 0x14c   :  { %v1493_v26 = vpop.f32.mrf.mxu1  ;;  %2552 = vmatprep.subr.bf16.mxu1 %v4869_v41 }
 0x14e   :  { %v1495_v28 = vpop.f32.mrf.mxu1 }
 0x14f   :  { %2553 = vmatpush2.bf16.msra.mxu1 %v4867_v21  ;;  %v4808_v28 = vld [vmem:[#allocation6 + $0x8] ss:$16 sps:$4 sm:$0xff]   ;;  %v341_v21 = vrot.slane %v5466_v44, %v340_v10 }
 0x150   :  { %v1496_v31 = vpop.f32.mrf.mxu1  ;;  %2604 = vmatprep.subr.bf16.mxu1 %v4872_v9  ;;  %v4839_v9 = vld [vmem:[#allocation6 + $0x16c] ss:$16 sps:$4 sm:$0xff]  }
 0x151   :  { %v4822_v31 = vld [vmem:[#allocation6 + $0x1cc] ss:$16 sps:$4 sm:$0xff]  }
 0x181   :  { %v1450_v49 = vpop.f32.mrf.mxu0 }
 0x182   :  { %v1451_v51 = vadd.f32 %v1450_v49, %v1410_v48  ;;  %v4845_v48 = vld [vmem:[#allocation6 + $0x14c] ss:$16 sps:$4 sm:$0xff]  }
 0x183   :  { %v1452_v52 = vpop.f32.mrf.mxu0 }
 0x184   :  { %v1492_v54 = vadd.f32 %v1491_v23, %v1451_v51  ;;  %v1453_v55 = vadd.f32 %v1452_v52, %v1412_v50  ;;  %v4798_v23 = vld [vmem:[#allocation6 + $0x4c] ss:$16 sps:$4 sm:$0xff]  }
 0x185   :  { %v1454_v56 = vpop.f32.mrf.mxu0 }
 0x186   :  { %v1666_v57 = vmul.f32 1.442695, %v1492_v54  ;;  %v1494_v58 = vadd.f32 %v1493_v26, %v1453_v55  ;;  %vm1662_vm2 = vcmp.gt.f32.partialorder %v1492_v54, 0.0  ;;  %v4802_v26 = vld [vmem:[#allocation6 + $0x28] ss:$16 sps:$4 sm:$0xff]  }
 0x187   :  { %v1455_v59 = vpop.f32.mrf.mxu0 }
 0x188   :  { %5124 = vpow2.f32 %v1666_v57  ;;  %v1668_v60 = vmul.f32 1.442695, %v1494_v58  ;;  %vm1663_vm3 = vcmp.gt.f32.partialorder %v1494_v58, 0.0  ;;  %v4851_v57 = vld [vmem:[#allocation6 + $0x12c] ss:$16 sps:$4 sm:$0xff]  }
 0x18a   :  { %v5478_v61 = vpop.f32.mrf.mxu1  ;;  %5126 = vpow2.f32 %v1668_v60 }
 0x18b   :  { %v1533_v37 = vadd.f32 %v5478_v61, %v341_v21  ;;  %v4890_v21 = vld [vmem:[#allocation6 + $0x22c] ss:$16 sps:$4 sm:$0xff]  }
 0x18c   :  { %v5480_v62 = vpop.f32.mrf.mxu1 }
 0x18d   :  { %v1535_v50 = vadd.f32 %v5480_v62, %v345_v20  ;;  %v1811_v20 = vld [vmem:[#allocation6 + $0x3e8] sm:$0x33] }
 0x18e   :  { %v1536_v63 = vpop.f32.mrf.mxu1 }
 0x18f   :  { %v4849_v63 = vld [vmem:[#allocation6 + $0x128] ss:$16 sps:$4 sm:$0xff]  }
 0x190   :  { %v1537_v0 = vpop.f32.mrf.mxu1 }
 0x195   :  { %v5125_v1 = vpop.eup %5124 }
 0x196   :  { %v4101_v2 = vadd.f32 -1.0, %v5125_v1  ;;  %v4857_v1 = vld [vmem:[#allocation6 + $0x10c] ss:$16 sps:$4 sm:$0xff]  }
 0x197   :  { %v5127_v3 = vpop.eup %5126 }
 0x198   :  { %v4102_v4 = vadd.f32 -1.0, %v5127_v3  ;;  %v1678_v5 = vsel %vm1662_vm2, %v1492_v54, %v4101_v2  ;;  %v4843_v54 = vld [vmem:[#allocation6 + $0x148] ss:$16 sps:$4 sm:$0xff]  }
 0x199   :  { %v5482_v11 = vpack.c.bf16 %v1678_v5, %v1678_v5 }
 0x19a   :  { %v1679_v6 = vsel %vm1663_vm3, %v1494_v58, %v4102_v4  ;;  %v4855_v4 = vld [vmem:[#allocation6 + $0x108] ss:$16 sps:$4 sm:$0xff]  }
 0x19b   :  { %v1683_v7 = vpack.c.bf16 %v1679_v6, %v1679_v6 }
 0x19d   :  { %2513 = vmatprep.mubr.bf16.mxu0 %v1683_v7 }
 0x19e   :  { %2514 = vmatmul.mubr.bf16.vlgmr.msra.gmra.mxu0 %v5482_v11 }
 0x19f   :  { %2564 = vmatpush1.bf16.msra.mxu0 %v4775_v8  ;;  %2595 = vmatprep.mubr.bf16.mxu0 %v1683_v7  ;;  %v4917_v7 = vld [vmem:[#allocation8 + $0x70] ss:$8 sps:$4 sm:$0xff]   ;;  %v4919_v8 = vld [vmem:[#allocation8 + $0x74] ss:$8 sps:$4 sm:$0xff]  }
 0x1a0   :  { %2565 = vmatprep.subr.bf16.mxu0 %v4780_v12 }
 0x1a3   :  { %2566 = vmatpush1.bf16.msra.mxu0 %v4778_v13  ;;  %v4922_v13 = vld [vmem:[#allocation8 + $0x64] ss:$8 sps:$4 sm:$0xff]  }
 0x1a4   :  { %2567 = vmatprep.subr.bf16.mxu0 %v4783_v14 }
 0x1a7   :  { %2568 = vmatpush1.bf16.msra.mxu0 %v4781_v15 }
 0x1a8   :  { %2569 = vmatprep.subr.bf16.mxu0 %v4786_v16  ;;  %v4920_v16 = vld [vmem:[#allocation8 + $0x60] ss:$8 sps:$4 sm:$0xff]  }
 0x1ab   :  { %2570 = vmatpush1.bf16.msra.mxu0 %v4784_v18 }
 0x1ac   :  { %2571 = vmatprep.subr.bf16.mxu0 %v4792_v19  ;;  %v4925_v19 = vld [vmem:[#allocation8 + $0x54] ss:$8 sps:$4 sm:$0xff]  }
 0x1af   :  { %2572 = vmatpush1.bf16.msra.mxu0 %v4790_v22 }
 0x1b0   :  { %2573 = vmatprep.subr.bf16.mxu0 %v4798_v23  ;;  %v4870_v23 = vld [vmem:[#allocation6 + $0x2e8] ss:$16 sps:$4 sm:$0xff]  }
 0x1b3   :  { %2574 = vmatpush1.bf16.msra.mxu0 %v4796_v24  ;;  %v4875_v24 = vld [vmem:[#allocation6 + $0x2cc] ss:$16 sps:$4 sm:$0xff]  }
 0x1b4   :  { %2575 = vmatprep.subr.bf16.mxu0 %v4804_v25  ;;  %v4923_v25 = vld [vmem:[#allocation8 + $0x50] ss:$8 sps:$4 sm:$0xff]  }
 0x1b7   :  { %2576 = vmatpush1.bf16.msra.mxu0 %v4802_v26  ;;  %v4928_v26 = vld [vmem:[#allocation8 + $0x44] ss:$8 sps:$4 sm:$0xff]  }
 0x1b8   :  { %2577 = vmatprep.subr.bf16.mxu0 %v4810_v27  ;;  %v4873_v27 = vld [vmem:[#allocation6 + $0x2c8] ss:$16 sps:$4 sm:$0xff]  }
 0x1bb   :  { %2578 = vmatpush1.bf16.msra.mxu0 %v4808_v28  ;;  %v4878_v28 = vld [vmem:[#allocation6 + $0x2ac] ss:$16 sps:$4 sm:$0xff]  }
 0x1bc   :  { %2579 = vmatprep.subr.bf16.mxu0 %v4816_v29  ;;  %v4926_v29 = vld [vmem:[#allocation8 + $0x40] ss:$8 sps:$4 sm:$0xff]  }
 0x1bf   :  { %2580 = vmatpush2.bf16.msra.mxu0 %v4814_v30  ;;  %v4931_v30 = vld [vmem:[#allocation8 + $0x34] ss:$8 sps:$4 sm:$0xff]  }
 0x1c0   :  { %2581 = vmatprep.subr.bf16.mxu0 %v4822_v31  ;;  %v4876_v31 = vld [vmem:[#allocation6 + $0x2a8] ss:$16 sps:$4 sm:$0xff]  }
 0x1c1   :  { %v1573_v34 = vpop.f32.mrf.mxu0 }
 0x1c2   :  { %v1574_v51 = vadd.f32 %v1573_v34, %v1533_v37  ;;  %v4934_v34 = vld [vmem:[#allocation8 + $0x24] ss:$8 sps:$4 sm:$0xff]   ;;  %v4231_v37 = vcombine.low %v1811_v20, %v1811_v20 }
 0x1c3   :  { %2582 = vmatpush2.bf16.msra.mxu0 %v4820_v32  ;;  %v1575_v35 = vpop.f32.mrf.mxu0  ;;  %v4881_v32 = vld [vmem:[#allocation6 + $0x28c] ss:$16 sps:$4 sm:$0xff]  }
 0x1c4   :  { %2583 = vmatprep.subr.bf16.mxu0 %v4828_v33  ;;  %v1576_v55 = vadd.f32 %v1575_v35, %v1535_v50  ;;  %v4929_v33 = vld [vmem:[#allocation8 + $0x30] ss:$8 sps:$4 sm:$0xff]  }
 0x1c5   :  { %v1577_v39 = vpop.f32.mrf.mxu0  ;;  %v4879_v35 = vld [vmem:[#allocation6 + $0x288] ss:$16 sps:$4 sm:$0xff]  }
 0x1c6   :  { %v4882_v39 = vld [vmem:[#allocation6 + $0x268] ss:$16 sps:$4 sm:$0xff]  }
 0x1c7   :  { %2584 = vmatpush2.bf16.msra.mxu0 %v4826_v36  ;;  %v1578_v41 = vpop.f32.mrf.mxu0  ;;  %v4884_v36 = vld [vmem:[#allocation6 + $0x26c] ss:$16 sps:$4 sm:$0xff]   ;;  %v4896_v50 = vld [vmem:[#allocation6 + $0x3c8] ss:$16 sps:$4 sm:$0xff]  }
 0x1c8   :  { %2585 = vmatprep.subr.bf16.mxu0 %v4834_v38  ;;  %v4932_v38 = vld [vmem:[#allocation8 + $0x20] ss:$8 sps:$4 sm:$0xff]  }
 0x1c9   :  { %v4885_v41 = vld [vmem:[#allocation6 + $0x248] ss:$16 sps:$4 sm:$0xff]  }
 0x1ca   :  { %v1614_v17 = vpop.f32.mrf.mxu1 }
 0x1cb   :  { %2586 = vmatpush2.bf16.msra.mxu0 %v4832_v40  ;;  %v1615_v56 = vadd.f32 %v1614_v17, %v1574_v51  ;;  %v4887_v40 = vld [vmem:[#allocation6 + $0x24c] ss:$16 sps:$4 sm:$0xff]  }
 0x1cc   :  { %v1616_v46 = vpop.f32.mrf.mxu1  ;;  %2587 = vmatprep.subr.bf16.mxu0 %v4839_v9  ;;  %v4888_v9 = vld [vmem:[#allocation6 + $0x228] ss:$16 sps:$4 sm:$0xff]   ;;  %v4893_v17 = vld [vmem:[#allocation6 + $0x20c] ss:$16 sps:$4 sm:$0xff]  }
 0x1cd   :  { %v1617_v44 = vadd.f32 %v1616_v46, %v1576_v55  ;;  %v4891_v46 = vld [vmem:[#allocation6 + $0x208] ss:$16 sps:$4 sm:$0xff]   ;;  %v4901_v51 = vld [vmem:[#allocation6 + $0x3ac] ss:$16 sps:$4 sm:$0xff]  }
 0x1ce   :  { %v1618_v49 = vpop.f32.mrf.mxu1  ;;  %v4902_v55 = vld [vmem:[#allocation6 + $0x388] ss:$16 sps:$4 sm:$0xff]  }
 0x1cf   :  { %2588 = vmatpush2.bf16.msra.mxu0 %v4837_v47  ;;  %v4232_v47 = vcombine.high %v1811_v20, %v1811_v20  ;;  %v4898_v49 = vld [vmem:[#allocation6 + $0x3cc] ss:$16 sps:$4 sm:$0xff]  }
 0x1d0   :  { %v1619_v52 = vpop.f32.mrf.mxu1  ;;  %2589 = vmatprep.subr.bf16.mxu0 %v4845_v48  ;;  %v2476_v48 = vsel %vm2468_vm1, %v4231_v37, 0 }
 0x1d1   :  { %v4899_v52 = vld [vmem:[#allocation6 + $0x3a8] ss:$16 sps:$4 sm:$0xff]  }
 0x1d2   :  { %v1655_v58 = vpop.f32.mrf.mxu1 }
 0x1d3   :  { %v1656_v59 = vadd.f32 %v1655_v58, %v1615_v56  ;;  %2590 = vmatpush2.bf16.msra.mxu0 %v4843_v54  ;;  %v4904_v54 = vld [vmem:[#allocation6 + $0x38c] ss:$16 sps:$4 sm:$0xff]  }
 0x1d4   :  { %v1657_v60 = vpop.f32.mrf.mxu1  ;;  %2591 = vmatprep.subr.bf16.mxu0 %v4851_v57  ;;  %v4907_v56 = vld [vmem:[#allocation6 + $0x36c] ss:$16 sps:$4 sm:$0xff]   ;;  %v4905_v57 = vld [vmem:[#allocation6 + $0x368] ss:$16 sps:$4 sm:$0xff]  }
 0x1d5   :  { %v1670_v61 = vmul.f32 1.442695, %v1656_v59  ;;  %v1658_v0 = vadd.f32 %v1657_v60, %v1617_v44  ;;  %vm1664_vm4 = vcmp.gt.f32.partialorder %v1656_v59, 0.0  ;;  %v4910_v58 = vld [vmem:[#allocation6 + $0x34c] ss:$16 sps:$4 sm:$0xff]  }
 0x1d6   :  { %v1659_v2 = vpop.f32.mrf.mxu1  ;;  %v4908_v44 = vld [vmem:[#allocation6 + $0x348] ss:$16 sps:$4 sm:$0xff]   ;;  %v4937_v60 = vld [vmem:[#allocation8 + $0x14] ss:$8 sps:$4 sm:$0xff]  }
 0x1d7   :  { %5128 = vpow2.f32 %v1670_v61  ;;  %v1672_v62 = vmul.f32 1.442695, %v1658_v0  ;;  %2592 = vmatpush2.bf16.msra.mxu0 %v4849_v63  ;;  %vm1665_vm5 = vcmp.gt.f32.partialorder %v1658_v0, 0.0  ;;  %v4935_v63 = vld [vmem:[#allocation8 + $0x10] ss:$8 sps:$4 sm:$0xff]  }
 0x1d8   :  { %v1660_v3 = vpop.f32.mrf.mxu1  ;;  %2593 = vmatprep.subr.bf16.mxu0 %v4857_v1  ;;  %v4911_v61 = vld [vmem:[#allocation6 + $0x328] ss:$16 sps:$4 sm:$0xff]   ;;  %v4940_v2 = vld [vmem:[#allocation8 + $0x4] ss:$8 sps:$4 sm:$0xff]  }
 0x1d9   :  { %5130 = vpow2.f32 %v1672_v62  ;;  %v4938_v1 = vld [vmem:[#allocation8] ss:$8 sps:$4 sm:$0xff]   ;;  %v4943_v62 = vld [vmem:[#allocation8 + $0xf4] ss:$8 sps:$4 sm:$0xff]  }
 0x1da   :  { %v4914_v3 = vld [vmem:[#allocation6 + $0x308] ss:$16 sps:$4 sm:$0xff]  }
 0x1db   :  { %2594 = vmatpush2.bf16.msra.mxu0 %v4855_v4  ;;  %v4941_v4 = vld [vmem:[#allocation8 + $0xf0] ss:$8 sps:$4 sm:$0xff]  }
 0x1dc   :  { %3068 = vmatprep.subr.bf16.mxu0 %v4919_v8  ;;  %v4947_v8 = vld [vmem:[#allocation8 + $0xd0] ss:$8 sps:$4 sm:$0xff]  }
 0x1de   :  { %2596 = vmatmul.mubr.bf16.vlgmr.msra.gmra.mxu0 %v5482_v11 }
 0x1df   :  { %3069 = vmatpush1.bf16.msra.mxu0 %v4917_v7  ;;  %v4949_v7 = vld [vmem:[#allocation8 + $0xd4] ss:$8 sps:$4 sm:$0xff]  }
 0x1e0   :  { %3070 = vmatprep.subr.bf16.mxu0 %v4922_v13  ;;  %v4950_v13 = vld [vmem:[#allocation8 + $0xc0] ss:$8 sps:$4 sm:$0xff]  }
 0x1e3   :  { %3071 = vmatpush1.bf16.msra.mxu0 %v4920_v16  ;;  %v4958_v16 = vld [vmem:[#allocation8 + $0xa4] ss:$8 sps:$4 sm:$0xff]  }
 0x1e4   :  { %v5129_v5 = vpop.eup %5128  ;;  %3072 = vmatprep.subr.bf16.mxu0 %v4925_v19  ;;  %v4961_v19 = vld [vmem:[#allocation8 + $0x94] ss:$8 sps:$4 sm:$0xff]  }
 0x1e5   :  { %v4103_v6 = vadd.f32 -1.0, %v5129_v5  ;;  %v4946_v5 = vld [vmem:[#allocation8 + $0xe4] ss:$8 sps:$4 sm:$0xff]  }
 0x1e6   :  { %v5131_v12 = vpop.eup %5130 }
 0x1e7   :  { %v4104_v14 = vadd.f32 -1.0, %v5131_v12  ;;  %v1680_v15 = vsel %vm1664_vm4, %v1656_v59, %v4103_v6  ;;  %3073 = vmatpush1.bf16.msra.mxu0 %v4923_v25  ;;  %v4913_v59 = vld [vmem:[#allocation6 + $0x32c] ss:$16 sps:$4 sm:$0xff]   ;;  %v4944_v6 = vld [vmem:[#allocation8 + $0xe0] ss:$8 sps:$4 sm:$0xff]  }
 0x1e8   :  { %v5496_v11 = vpack.c.bf16 %v1680_v15, %v1680_v15  ;;  %3074 = vmatprep.subr.bf16.mxu0 %v4928_v26  ;;  %v4952_v12 = vld [vmem:[#allocation8 + $0xc4] ss:$8 sps:$4 sm:$0xff]   ;;  %v4953_v15 = vld [vmem:[#allocation8 + $0xb0] ss:$8 sps:$4 sm:$0xff]  }
 0x1e9   :  { %v1681_v18 = vsel %vm1665_vm5, %v1658_v0, %v4104_v14  ;;  %v4916_v0 = vld [vmem:[#allocation6 + $0x30c] ss:$16 sps:$4 sm:$0xff]   ;;  %v4965_v25 = vld [vmem:[#allocation8 + $0x170] ss:$8 sps:$4 sm:$0xff]  }
 0x1ea   :  { %v1685_v22 = vpack.c.bf16 %v1681_v18, %v1681_v18  ;;  %v4955_v14 = vld [vmem:[#allocation8 + $0xb4] ss:$8 sps:$4 sm:$0xff]   ;;  %v4956_v18 = vld [vmem:[#allocation8 + $0xa0] ss:$8 sps:$4 sm:$0xff]   ;;  %v4970_v26 = vld [vmem:[#allocation8 + $0x164] ss:$8 sps:$4 sm:$0xff]  }
 0x1eb   :  { %3075 = vmatpush1.bf16.msra.mxu0 %v4926_v29  ;;  %v4971_v29 = vld [vmem:[#allocation8 + $0x150] ss:$8 sps:$4 sm:$0xff]  }
 0x1ec   :  { %4234 = vmatprep.mubr.msk.bf16.mxu1 %vm2464_vm6, %v1685_v22  ;;  %3076 = vmatprep.subr.bf16.mxu0 %v4931_v30  ;;  %v4976_v30 = vld [vmem:[#allocation8 + $0x144] ss:$8 sps:$4 sm:$0xff]  }
 0x1ed   :  { %2555 = vmatmul.mubr.bf16.vlgmr.msra.gmra.mxu1 %v5496_v11 }
 0x1ee   :  { %2605 = vmatpush1.bf16.msra.mxu1 %v4870_v23  ;;  %4236 = vmatprep.mubr.msk.bf16.mxu1 %vm2464_vm6, %v1685_v22  ;;  %v4959_v22 = vld [vmem:[#allocation8 + $0x90] ss:$8 sps:$4 sm:$0xff]   ;;  %v4962_v23 = vld [vmem:[#allocation8 + $0x80] ss:$8 sps:$4 sm:$0xff]  }
 0x1ef   :  { %2606 = vmatprep.subr.bf16.mxu1 %v4875_v24  ;;  %3077 = vmatpush1.bf16.msra.mxu0 %v4929_v33  ;;  %v4967_v24 = vld [vmem:[#allocation8 + $0x174] ss:$8 sps:$4 sm:$0xff]   ;;  %v4977_v33 = vld [vmem:[#allocation8 + $0x130] ss:$8 sps:$4 sm:$0xff]  }
 0x1f0   :  { %3078 = vmatprep.subr.bf16.mxu0 %v4934_v34  ;;  %v4982_v34 = vld [vmem:[#allocation8 + $0x124] ss:$8 sps:$4 sm:$0xff]  }
 0x1f2   :  { %2607 = vmatpush1.bf16.msra.mxu1 %v4873_v27  ;;  %v4968_v27 = vld [vmem:[#allocation8 + $0x160] ss:$8 sps:$4 sm:$0xff]  }
 0x1f3   :  { %2608 = vmatprep.subr.bf16.mxu1 %v4878_v28  ;;  %3079 = vmatpush1.bf16.msra.mxu0 %v4932_v38  ;;  %v4973_v28 = vld [vmem:[#allocation8 + $0x154] ss:$8 sps:$4 sm:$0xff]   ;;  %v4983_v38 = vld [vmem:[#allocation8 + $0x110] ss:$8 sps:$4 sm:$0xff]  }
 0x1f4   :  { %3080 = vmatprep.subr.bf16.mxu0 %v4937_v60  ;;  %v5011_v60 = vld [vmem:[#allocation8 + $0x184] ss:$8 sps:$4 sm:$0xff]  }
 0x1f6   :  { %2609 = vmatpush1.bf16.msra.mxu1 %v4876_v31  ;;  %v4974_v31 = vld [vmem:[#allocation8 + $0x140] ss:$8 sps:$4 sm:$0xff]  }
 0x1f7   :  { %2610 = vmatprep.subr.bf16.mxu1 %v4881_v32  ;;  %3081 = vmatpush1.bf16.msra.mxu0 %v4935_v63  ;;  %v4979_v32 = vld [vmem:[#allocation8 + $0x134] ss:$8 sps:$4 sm:$0xff]   ;;  %v5009_v63 = vld [vmem:[#allocation8 + $0x180] ss:$8 sps:$4 sm:$0xff]  }
 0x1f8   :  { %3082 = vmatprep.subr.bf16.mxu0 %v4940_v2  ;;  %v1812_v2 = vld [vmem:[%s5598_s4] sm:$0xf] }
 0x1fa   :  { %2611 = vmatpush1.bf16.msra.mxu1 %v4879_v35  ;;  %v4980_v35 = vld [vmem:[#allocation8 + $0x120] ss:$8 sps:$4 sm:$0xff]  }
 0x1fb   :  { %2612 = vmatprep.subr.bf16.mxu1 %v4884_v36  ;;  %3083 = vmatpush1.bf16.msra.mxu0 %v4938_v1  ;;  %v4985_v36 = vld [vmem:[#allocation8 + $0x114] ss:$8 sps:$4 sm:$0xff]  }
 0x1fc   :  { %3084 = vmatprep.subr.bf16.mxu0 %v4943_v62 }
 0x1fe   :  { %2613 = vmatpush1.bf16.msra.mxu1 %v4882_v39  ;;  %v4988_v39 = vld [vmem:[#allocation8 + $0x104] ss:$8 sps:$4 sm:$0xff]  }
 0x1ff   :  { %2614 = vmatprep.subr.bf16.mxu1 %v4887_v40  ;;  %3085 = vmatpush2.bf16.msra.mxu0 %v4941_v4  ;;  %v1821_v4 = vrot.slane %v1812_v2, %v5469_v45 }
 0x200   :  { %3086 = vmatprep.subr.bf16.mxu0 %v4946_v5 }
 0x202   :  { %2615 = vmatpush1.bf16.msra.mxu1 %v4885_v41  ;;  %v2731_v41 = vld [vmem:[#allocation8 + $0x1f0] sm:$0x33] }
 0x203   :  { %2616 = vmatprep.subr.bf16.mxu1 %v4890_v21  ;;  %3087 = vmatpush2.bf16.msra.mxu0 %v4944_v6  ;;  %v4303_v20 = vcombine.low %v2731_v41, %v2731_v41 }
 0x204   :  { %3088 = vmatprep.subr.bf16.mxu0 %v4949_v7 }
 0x205   :  { %v3063_v37 = vsel %vm2468_vm1, %v4303_v20, 0 }
 0x206   :  { %2617 = vmatpush1.bf16.msra.mxu1 %v4888_v9  ;;  %v4986_v9 = vld [vmem:[#allocation8 + $0x100] ss:$8 sps:$4 sm:$0xff]  }
 0x207   :  { %2618 = vmatprep.subr.bf16.mxu1 %v4893_v17  ;;  %3089 = vmatpush2.bf16.msra.mxu0 %v4947_v8  ;;  %v4304_v17 = vcombine.high %v2731_v41, %v2731_v41 }
 0x208   :  { %3090 = vmatprep.subr.bf16.mxu0 %v4952_v12 }
 0x20a   :  { %2619 = vmatpush1.bf16.msra.mxu1 %v4891_v46 }
 0x20b   :  { %4235 = vmatprep.subr.msk.bf16.mxu1 %vm2468_vm1, %v4232_v47  ;;  %3091 = vmatpush2.bf16.msra.mxu0 %v4950_v13 }
 0x20c   :  { %3092 = vmatprep.subr.bf16.mxu0 %v4955_v14 }
 0x20e   :  { %2621 = vmatpush2.bf16.msra.mxu1 %v2476_v48  ;;  %v4993_v48 = vld [vmem:[#allocation8 + $0x1e4] ss:$8 sps:$4 sm:$0xff]  }
 0x20f   :  { %2622 = vmatprep.subr.bf16.mxu1 %v4898_v49  ;;  %3093 = vmatpush2.bf16.msra.mxu0 %v4953_v15  ;;  %v4991_v49 = vld [vmem:[#allocation8 + $0x1e0] ss:$8 sps:$4 sm:$0xff]  }
 0x210   :  { %3094 = vmatprep.subr.bf16.mxu0 %v4958_v16 }
 0x212   :  { %2623 = vmatpush2.bf16.msra.mxu1 %v4896_v50  ;;  %v4996_v50 = vld [vmem:[#allocation8 + $0x1d4] ss:$8 sps:$4 sm:$0xff]  }
 0x213   :  { %2624 = vmatprep.subr.bf16.mxu1 %v4901_v51  ;;  %3095 = vmatpush2.bf16.msra.mxu0 %v4956_v18  ;;  %v4994_v51 = vld [vmem:[#allocation8 + $0x1d0] ss:$8 sps:$4 sm:$0xff]  }
 0x214   :  { %3096 = vmatprep.subr.bf16.mxu0 %v4961_v19 }
 0x216   :  { %2625 = vmatpush2.bf16.msra.mxu1 %v4899_v52  ;;  %v4999_v52 = vld [vmem:[#allocation8 + $0x1c4] ss:$8 sps:$4 sm:$0xff]  }
 0x217   :  { %2626 = vmatprep.subr.bf16.mxu1 %v4904_v54  ;;  %3097 = vmatpush2.bf16.msra.mxu0 %v4959_v22  ;;  %v4997_v54 = vld [vmem:[#allocation8 + $0x1c0] ss:$8 sps:$4 sm:$0xff]  }
 0x21a   :  { %2627 = vmatpush2.bf16.msra.mxu1 %v4902_v55  ;;  %v5002_v55 = vld [vmem:[#allocation8 + $0x1b4] ss:$8 sps:$4 sm:$0xff]  }
 0x21b   :  { %2628 = vmatprep.subr.bf16.mxu1 %v4907_v56  ;;  %v5000_v56 = vld [vmem:[#allocation8 + $0x1b0] ss:$8 sps:$4 sm:$0xff]  }
 0x21e   :  { %2629 = vmatpush2.bf16.msra.mxu1 %v4905_v57  ;;  %v5005_v57 = vld [vmem:[#allocation8 + $0x1a4] ss:$8 sps:$4 sm:$0xff]  }
 0x21f   :  { %2630 = vmatprep.subr.bf16.mxu1 %v4910_v58  ;;  %v5003_v58 = vld [vmem:[#allocation8 + $0x1a0] ss:$8 sps:$4 sm:$0xff]  }
 0x222   :  { %2631 = vmatpush2.bf16.msra.mxu1 %v4908_v44  ;;  %v5008_v44 = vld [vmem:[#allocation8 + $0x194] ss:$8 sps:$4 sm:$0xff]  }
 0x223   :  { %2632 = vmatprep.subr.bf16.mxu1 %v4913_v59  ;;  %v5006_v59 = vld [vmem:[#allocation8 + $0x190] ss:$8 sps:$4 sm:$0xff]  }
 0x226   :  { %2633 = vmatpush2.bf16.msra.mxu1 %v4911_v61 }
 0x227   :  { %2634 = vmatprep.subr.bf16.mxu1 %v4916_v0 }
 0x22a   :  { %2635 = vmatpush2.bf16.msra.mxu1 %v4914_v3  ;;  %v1817_v3 = vrot.slane %v1812_v2, %v5461_v43 }
 0x22b   :  { %3109 = vmatprep.subr.bf16.mxu1 %v4967_v24 }
 0x22d   :  { %2637 = vmatmul.mubr.bf16.vlgmr.msra.gmra.mxu1 %v5496_v11  ;;  %v4964_v11 = vld [vmem:[#allocation8 + $0x84] ss:$8 sps:$4 sm:$0xff]  }
 0x22e   :  { %3098 = vmatprep.subr.bf16.mxu0 %v4964_v11  ;;  %3110 = vmatpush1.bf16.msra.mxu1 %v4965_v25 }
 0x22f   :  { %3099 = vmatpush2.bf16.msra.mxu0 %v4962_v23  ;;  %3111 = vmatprep.subr.bf16.mxu1 %v4970_v26 }
 0x232   :  { %3112 = vmatpush1.bf16.msra.mxu1 %v4968_v27 }
 0x233   :  { %3113 = vmatprep.subr.bf16.mxu1 %v4973_v28  ;;  %v1825_v28 = vrot.slane %v1812_v2, %v340_v10 }
 0x236   :  { %3114 = vmatpush1.bf16.msra.mxu1 %v4971_v29  ;;  %v1829_v29 = vrot.slane %v1812_v2, %v344_v53  ;;  %v5039_v2 = vld [vmem:[#allocation9 + $0xe0] ss:$8 sps:$4 sm:$0xff]  }
 0x237   :  { %3115 = vmatprep.subr.bf16.mxu1 %v4976_v30 }
 0x23a   :  { %3116 = vmatpush1.bf16.msra.mxu1 %v4974_v31 }
 0x23b   :  { %3117 = vmatprep.subr.bf16.mxu1 %v4979_v32 }
 0x23e   :  { %3118 = vmatpush1.bf16.msra.mxu1 %v4977_v33 }
 0x23f   :  { %3119 = vmatprep.subr.bf16.mxu1 %v4982_v34 }
 0x242   :  { %3120 = vmatpush1.bf16.msra.mxu1 %v4980_v35 }
 0x243   :  { %3121 = vmatprep.subr.bf16.mxu1 %v4985_v36 }
 0x246   :  { %3122 = vmatpush1.bf16.msra.mxu1 %v4983_v38 }
 0x247   :  { %3123 = vmatprep.subr.bf16.mxu1 %v4988_v39 }
 0x24a   :  { %3124 = vmatpush1.bf16.msra.mxu1 %v4986_v9 }
 0x24b   :  { %4305 = vmatprep.subr.msk.bf16.mxu1 %vm2468_vm1, %v4304_v17 }
 0x24e   :  { %3126 = vmatpush2.bf16.msra.mxu1 %v3063_v37  ;;  %v5017_v37 = vld [vmem:[#allocation9 + $0x64] ss:$8 sps:$4 sm:$0xff]  }
 0x24f   :  { %3127 = vmatprep.subr.bf16.mxu1 %v4993_v48  ;;  %v5015_v48 = vld [vmem:[#allocation9 + $0x60] ss:$8 sps:$4 sm:$0xff]  }
 0x252   :  { %3128 = vmatpush2.bf16.msra.mxu1 %v4991_v49  ;;  %v5020_v49 = vld [vmem:[#allocation9 + $0x54] ss:$8 sps:$4 sm:$0xff]  }
 0x253   :  { %3129 = vmatprep.subr.bf16.mxu1 %v4996_v50  ;;  %v5018_v50 = vld [vmem:[#allocation9 + $0x50] ss:$8 sps:$4 sm:$0xff]  }
 0x256   :  { %3130 = vmatpush2.bf16.msra.mxu1 %v4994_v51  ;;  %v5023_v51 = vld [vmem:[#allocation9 + $0x44] ss:$8 sps:$4 sm:$0xff]  }
 0x257   :  { %3131 = vmatprep.subr.bf16.mxu1 %v4999_v52  ;;  %v5021_v52 = vld [vmem:[#allocation9 + $0x40] ss:$8 sps:$4 sm:$0xff]  }
 0x25a   :  { %3132 = vmatpush2.bf16.msra.mxu1 %v4997_v54  ;;  %v5026_v54 = vld [vmem:[#allocation9 + $0x34] ss:$8 sps:$4 sm:$0xff]  }
 0x25b   :  { %3133 = vmatprep.subr.bf16.mxu1 %v5002_v55  ;;  %v5024_v55 = vld [vmem:[#allocation9 + $0x30] ss:$8 sps:$4 sm:$0xff]  }
 0x25e   :  { %v2515_v40 = vpop.f32.mrf.mxu0  ;;  %3134 = vmatpush2.bf16.msra.mxu1 %v5000_v56  ;;  %v5029_v56 = vld [vmem:[#allocation9 + $0x24] ss:$8 sps:$4 sm:$0xff]  }
 0x25f   :  { %3135 = vmatprep.subr.bf16.mxu1 %v5005_v57  ;;  %v2516_v5 = vadd.f32 %v2515_v40, %v1817_v3  ;;  %v5027_v57 = vld [vmem:[#allocation9 + $0x20] ss:$8 sps:$4 sm:$0xff]   ;;  %v5042_v3 = vld [vmem:[#allocation9 + $0xd0] ss:$8 sps:$4 sm:$0xff]  }
 0x260   :  { %v2517_v21 = vpop.f32.mrf.mxu0 }
 0x261   :  { %v2518_v7 = vadd.f32 %v2517_v21, %v1821_v4  ;;  %v5047_v4 = vld [vmem:[#allocation9 + $0xc4] ss:$8 sps:$4 sm:$0xff]  }
 0x262   :  { %v2519_v46 = vpop.f32.mrf.mxu0  ;;  %3136 = vmatpush2.bf16.msra.mxu1 %v5003_v58  ;;  %v5032_v58 = vld [vmem:[#allocation9 + $0x14] ss:$8 sps:$4 sm:$0xff]  }
 0x263   :  { %3137 = vmatprep.subr.bf16.mxu1 %v5008_v44  ;;  %v5012_v46 = vld [vmem:[#allocation9 + $0x70] ss:$8 sps:$4 sm:$0xff]  }
 0x264   :  { %v2520_v47 = vpop.f32.mrf.mxu0  ;;  %v5030_v44 = vld [vmem:[#allocation9 + $0x10] ss:$8 sps:$4 sm:$0xff]  }
 0x265   :  { %v5014_v47 = vld [vmem:[#allocation9 + $0x74] ss:$8 sps:$4 sm:$0xff]  }
 0x266   :  { %3138 = vmatpush2.bf16.msra.mxu1 %v5006_v59  ;;  %3375 = vmatprep.subr.bf16.mxu0 %v5014_v47  ;;  %v5035_v59 = vld [vmem:[#allocation9 + $0x4] ss:$8 sps:$4 sm:$0xff]  }
 0x267   :  { %3139 = vmatprep.subr.bf16.mxu1 %v5011_v60  ;;  %v5033_v60 = vld [vmem:[#allocation9] ss:$8 sps:$4 sm:$0xff]  }
 0x26a   :  { %3140 = vmatpush2.bf16.msra.mxu1 %v5009_v63  ;;  %v5036_v63 = vld [vmem:[#allocation9 + $0xf4] ss:$8 sps:$4 sm:$0x1f]  }
 0x29e   :  { %v2597_v61 = vpop.f32.mrf.mxu0 }
 0x29f   :  { %v2598_v30 = vadd.f32 %v2597_v61, %v1825_v28  ;;  %v5038_v61 = vld [vmem:[#allocation9 + $0xf0] ss:$8 sps:$4 sm:$0x1f]  }
 0x2a0   :  { %v2599_v0 = vpop.f32.mrf.mxu0  ;;  %v5072_v28 = vld [vmem:[#allocation11 + $0x30] ss:$8 sps:$4 sm:$0xff]  }
 0x2a1   :  { %v2600_v32 = vadd.f32 %v2599_v0, %v1829_v29  ;;  %v3370_v0 = vsel %vm3368_vm11, %v5038_v61, 0  ;;  %v5077_v29 = vld [vmem:[#allocation11 + $0x24] ss:$8 sps:$4 sm:$0xff]   ;;  %v5092_v61 = vld [vmem:[#allocation11 + $0xd4] ss:$8 sps:$4 sm:$0xff]  }
 0x2a2   :  { %v2601_v1 = vpop.f32.mrf.mxu0 }
 0x2a3   :  { %v5041_v1 = vld [vmem:[#allocation9 + $0xe4] ss:$8 sps:$4 sm:$0xff]  }
 0x2a4   :  { %v2602_v62 = vpop.f32.mrf.mxu0 }
 0x2a5   :  { %v5044_v62 = vld [vmem:[#allocation9 + $0xd4] ss:$8 sps:$4 sm:$0xff]  }
 0x2ad   :  { %v2556_v6 = vpop.f32.mrf.mxu1 }
 0x2ae   :  { %v2557_v8 = vadd.f32 %v2556_v6, %v2516_v5  ;;  %v5045_v5 = vld [vmem:[#allocation9 + $0xc0] ss:$8 sps:$4 sm:$0xff]   ;;  %v5050_v6 = vld [vmem:[#allocation9 + $0xb4] ss:$8 sps:$4 sm:$0xff]  }
 0x2af   :  { %v2558_v12 = vpop.f32.mrf.mxu1 }
 0x2b0   :  { %v2649_v13 = vmul.f32 1.442695, %v2557_v8  ;;  %v2559_v14 = vadd.f32 %v2558_v12, %v2518_v7  ;;  %vm2645_vm7 = vcmp.gt.f32.partialorder %v2557_v8, 0.0  ;;  %v5048_v7 = vld [vmem:[#allocation9 + $0xb0] ss:$8 sps:$4 sm:$0xff]  }
 0x2b1   :  { %v2560_v15 = vpop.f32.mrf.mxu1  ;;  %v5051_v12 = vld [vmem:[#allocation9 + $0xa0] ss:$8 sps:$4 sm:$0xff]  }
 0x2b2   :  { %5132 = vpow2.f32 %v2649_v13  ;;  %v2651_v16 = vmul.f32 1.442695, %v2559_v14  ;;  %vm2646_vm8 = vcmp.gt.f32.partialorder %v2559_v14, 0.0  ;;  %v5056_v13 = vld [vmem:[#allocation9 + $0x94] ss:$8 sps:$4 sm:$0xff]  }
 0x2b3   :  { %v2561_v18 = vpop.f32.mrf.mxu1  ;;  %v5059_v15 = vld [vmem:[#allocation9 + $0x84] ss:$8 sps:$4 sm:$0xff]  }
 0x2b4   :  { %5134 = vpow2.f32 %v2651_v16  ;;  %v5057_v16 = vld [vmem:[#allocation9 + $0x80] ss:$8 sps:$4 sm:$0xff]   ;;  %v5060_v18 = vld [vmem:[#allocation11 + $0x70] ss:$8 sps:$4 sm:$0xff]  }
 0x2bf   :  { %v5133_v19 = vpop.eup %5132 }
 0x2c0   :  { %v4237_v22 = vadd.f32 -1.0, %v5133_v19  ;;  %v5062_v19 = vld [vmem:[#allocation11 + $0x74] ss:$8 sps:$4 sm:$0xff]  }
 0x2c1   :  { %v5135_v23 = vpop.eup %5134  ;;  %3639 = vmatprep.subr.bf16.mxu1 %v5062_v19 }
 0x2c2   :  { %v4238_v11 = vadd.f32 -1.0, %v5135_v23  ;;  %v2661_v24 = vsel %vm2645_vm7, %v2557_v8, %v4237_v22  ;;  %v5053_v8 = vld [vmem:[#allocation9 + $0xa4] ss:$8 sps:$4 sm:$0xff]   ;;  %v5063_v23 = vld [vmem:[#allocation11 + $0x60] ss:$8 sps:$4 sm:$0xff]  }
 0x2c3   :  { %v2665_v27 = vpack.c.bf16 %v2661_v24, %v2661_v24  ;;  %v5065_v22 = vld [vmem:[#allocation11 + $0x64] ss:$8 sps:$4 sm:$0xff]   ;;  %v5066_v24 = vld [vmem:[#allocation11 + $0x50] ss:$8 sps:$4 sm:$0xff]  }
 0x2c4   :  { %v2662_v25 = vsel %vm2646_vm8, %v2559_v14, %v4238_v11  ;;  %v5054_v14 = vld [vmem:[#allocation9 + $0x90] ss:$8 sps:$4 sm:$0xff]   ;;  %v5068_v11 = vld [vmem:[#allocation11 + $0x54] ss:$8 sps:$4 sm:$0xff]  }
 0x2c5   :  { %v2666_v26 = vpack.c.bf16 %v2662_v25, %v2662_v25  ;;  %v5071_v25 = vld [vmem:[#allocation11 + $0x44] ss:$8 sps:$4 sm:$0xff]  }
 0x2c7   :  { %3100 = vmatprep.mubr.bf16.mxu0 %v2666_v26  ;;  %v5069_v26 = vld [vmem:[#allocation11 + $0x40] ss:$8 sps:$4 sm:$0xff]  }
 0x2c8   :  { %3101 = vmatmul.mubr.bf16.vlgmr.msra.gmra.mxu0 %v2665_v27  ;;  %v5074_v27 = vld [vmem:[#allocation11 + $0x34] ss:$8 sps:$4 sm:$0xff]  }
 0x2c9   :  { %3376 = vmatpush1.bf16.msra.mxu0 %v5012_v46 }
 0x2ca   :  { %3377 = vmatprep.subr.bf16.mxu0 %v5017_v37 }
 0x2cd   :  { %3378 = vmatpush1.bf16.msra.mxu0 %v5015_v48 }
 0x2ce   :  { %3379 = vmatprep.subr.bf16.mxu0 %v5020_v49 }
 0x2d1   :  { %3380 = vmatpush1.bf16.msra.mxu0 %v5018_v50 }
 0x2d2   :  { %3381 = vmatprep.subr.bf16.mxu0 %v5023_v51 }
 0x2d5   :  { %3382 = vmatpush1.bf16.msra.mxu0 %v5021_v52 }
 0x2d6   :  { %3383 = vmatprep.subr.bf16.mxu0 %v5026_v54 }
 0x2d9   :  { %3384 = vmatpush1.bf16.msra.mxu0 %v5024_v55 }
 0x2da   :  { %3385 = vmatprep.subr.bf16.mxu0 %v5029_v56 }
 0x2dd   :  { %3386 = vmatpush1.bf16.msra.mxu0 %v5027_v57 }
 0x2de   :  { %3387 = vmatprep.subr.bf16.mxu0 %v5032_v58 }
 0x2e1   :  { %3388 = vmatpush1.bf16.msra.mxu0 %v5030_v44 }
 0x2e2   :  { %3389 = vmatprep.subr.bf16.mxu0 %v5035_v59 }
 0x2e5   :  { %3390 = vmatpush1.bf16.msra.mxu0 %v5033_v60 }
 0x2e6   :  { %4341 = vmatprep.subr.msk.bf16.mxu0 %vm3368_vm11, %v5036_v63 }
 0x2e9   :  { %3392 = vmatpush2.bf16.msra.mxu0 %v3370_v0  ;;  %v5090_v0 = vld [vmem:[#allocation11 + $0xd0] ss:$8 sps:$4 sm:$0xff]  }
 0x2ea   :  { %3393 = vmatprep.subr.bf16.mxu0 %v5041_v1  ;;  %v5095_v1 = vld [vmem:[#allocation11 + $0xc4] ss:$8 sps:$4 sm:$0xff]  }
 0x2ed   :  { %v2638_v31 = vpop.f32.mrf.mxu1  ;;  %3394 = vmatpush2.bf16.msra.mxu0 %v5039_v2  ;;  %v5093_v2 = vld [vmem:[#allocation11 + $0xc0] ss:$8 sps:$4 sm:$0xff]  }
 0x2ee   :  { %v2639_v33 = vadd.f32 %v2638_v31, %v2598_v30  ;;  %3395 = vmatprep.subr.bf16.mxu0 %v5044_v62  ;;  %v5075_v30 = vld [vmem:[#allocation11 + $0x20] ss:$8 sps:$4 sm:$0xff]   ;;  %v5080_v31 = vld [vmem:[#allocation11 + $0x14] ss:$8 sps:$4 sm:$0xff]  }
 0x2ef   :  { %v2640_v34 = vpop.f32.mrf.mxu1  ;;  %v5098_v62 = vld [vmem:[#allocation11 + $0xb4] ss:$8 sps:$4 sm:$0xff]  }
 0x2f0   :  { %v2653_v35 = vmul.f32 1.442695, %v2639_v33  ;;  %v2641_v36 = vadd.f32 %v2640_v34, %v2600_v32  ;;  %vm2647_vm9 = vcmp.gt.f32.partialorder %v2639_v33, 0.0  ;;  %v5078_v32 = vld [vmem:[#allocation11 + $0x10] ss:$8 sps:$4 sm:$0xff]  }
 0x2f1   :  { %v2642_v38 = vpop.f32.mrf.mxu1  ;;  %3396 = vmatpush2.bf16.msra.mxu0 %v5042_v3  ;;  %v5081_v34 = vld [vmem:[#allocation11] ss:$8 sps:$4 sm:$0xff]   ;;  %v5096_v3 = vld [vmem:[#allocation11 + $0xb0] ss:$8 sps:$4 sm:$0xff]  }
 0x2f2   :  { %5136 = vpow2.f32 %v2653_v35  ;;  %v2655_v39 = vmul.f32 1.442695, %v2641_v36  ;;  %vm2648_vm10 = vcmp.gt.f32.partialorder %v2641_v36, 0.0  ;;  %3397 = vmatprep.subr.bf16.mxu0 %v5047_v4  ;;  %v5084_v35 = vld [vmem:[#allocation11 + $0xf4] ss:$8 sps:$4 sm:$0x1f]  }
 0x2f3   :  { %v2643_v40 = vpop.f32.mrf.mxu1  ;;  %v5101_v4 = vld [vmem:[#allocation11 + $0xa4] ss:$8 sps:$4 sm:$0xff]  }
 0x2f4   :  { %5138 = vpow2.f32 %v2655_v39  ;;  %v5089_v39 = vld [vmem:[#allocation11 + $0xe4] ss:$8 sps:$4 sm:$0xff]   ;;  %v5087_v40 = vld [vmem:[#allocation11 + $0xe0] ss:$8 sps:$4 sm:$0xff]  }
 0x2f5   :  { %3398 = vmatpush2.bf16.msra.mxu0 %v5045_v5  ;;  %v5099_v5 = vld [vmem:[#allocation11 + $0xa0] ss:$8 sps:$4 sm:$0xff]  }
 0x2f6   :  { %3399 = vmatprep.subr.bf16.mxu0 %v5050_v6  ;;  %v5104_v6 = vld [vmem:[#allocation11 + $0x94] ss:$8 sps:$4 sm:$0xff]  }
 0x2f9   :  { %3400 = vmatpush2.bf16.msra.mxu0 %v5048_v7  ;;  %v5102_v7 = vld [vmem:[#allocation11 + $0x90] ss:$8 sps:$4 sm:$0xff]  }
 0x2fa   :  { %3401 = vmatprep.subr.bf16.mxu0 %v5053_v8  ;;  %v5107_v8 = vld [vmem:[#allocation11 + $0x84] ss:$8 sps:$4 sm:$0xff]  }
 0x2fd   :  { %3402 = vmatpush2.bf16.msra.mxu0 %v5051_v12  ;;  %v5105_v12 = vld [vmem:[#allocation11 + $0x80] ss:$8 sps:$4 sm:$0xff]  }
 0x2fe   :  { %3403 = vmatprep.subr.bf16.mxu0 %v5056_v13  ;;  %v5108_v13 = vld [vmem:[%s5605_s11 + $0x78] sm:$0x1f]  }
 0x2ff   :  { %v5137_v41 = vpop.eup %5136 }
 0x300   :  { %v4239_v21 = vadd.f32 -1.0, %v5137_v41 }
 0x301   :  { %v5139_v9 = vpop.eup %5138  ;;  %3404 = vmatpush2.bf16.msra.mxu0 %v5054_v14  ;;  %v5109_v14 = vld [vmem:[%s5605_s11 + $0x38] sm:$0xff]  }
 0x302   :  { %v4240_v10 = vadd.f32 -1.0, %v5139_v9  ;;  %v2663_v17 = vsel %vm2647_vm9, %v2639_v33, %v4239_v21  ;;  %3405 = vmatprep.subr.bf16.mxu0 %v5059_v15  ;;  %v5083_v33 = vld [vmem:[#allocation11 + $0x4] ss:$8 sps:$4 sm:$0xff]  }
 0x303   :  { %v2667_v20 = vpack.c.bf16 %v2663_v17, %v2663_v17  ;;  %v2732_v17 = vld [vmem:[%s5600_s6] sm:$0x3]  ;;  %v5110_v15 = vld [vmem:[%s5605_s11 + $0x70] sm:$0xff]  }
 0x304   :  { %v2664_v42 = vsel %vm2648_vm10, %v2641_v36, %v4240_v10  ;;  %v5086_v36 = vld [vmem:[#allocation11 + $0xf0] ss:$8 sps:$4 sm:$0x1f]  }
 0x305   :  { %v2668_v53 = vpack.c.bf16 %v2664_v42, %v2664_v42  ;;  %3406 = vmatpush2.bf16.msra.mxu0 %v5057_v16  ;;  %v3634_v38 = vsel %vm3368_vm11, %v5086_v36, 0  ;;  %v2737_v42 = vrot.slane %v2732_v17, %v5461_v43  ;;  %v3194_v16 = vld [vmem:[%s5602_s8] sm:$0x3] }
 0x306   :  { %4421 = vmatprep.subr.msk.bf16.mxu0 %vm3368_vm11, %v5108_v13  ;;  %v3203_v19 = vrot.slane %v3194_v16, %v5469_v45 }
 0x307   :  { %4306 = vmatprep.mubr.msk.bf16.mxu1 %vm2464_vm6, %v2668_v53  ;;  %v2741_v53 = vrot.slane %v2732_v17, %v5469_v45  ;;  %v5118_v17 = vld [vmem:[%s5605_s11 + $0x50] sm:$0xff]  }
 0x308   :  { %3142 = vmatmul.mubr.bf16.vlgmr.msra.gmra.mxu1 %v2667_v20 }
 0x309   :  { %3640 = vmatpush1.bf16.msra.mxu1 %v5060_v18  ;;  %v3199_v18 = vrot.slane %v3194_v16, %v5461_v43 }
 0x30a   :  { %3641 = vmatprep.subr.bf16.mxu1 %v5065_v22 }
 0x30d   :  { %3642 = vmatpush1.bf16.msra.mxu1 %v5063_v23 }
 0x30e   :  { %3643 = vmatprep.subr.bf16.mxu1 %v5068_v11 }
 0x311   :  { %3644 = vmatpush1.bf16.msra.mxu1 %v5066_v24 }
 0x312   :  { %3645 = vmatprep.subr.bf16.mxu1 %v5071_v25 }
 0x315   :  { %3646 = vmatpush1.bf16.msra.mxu1 %v5069_v26 }
 0x316   :  { %3647 = vmatprep.subr.bf16.mxu1 %v5074_v27 }
 0x319   :  { %3648 = vmatpush1.bf16.msra.mxu1 %v5072_v28 }
 0x31a   :  { %3649 = vmatprep.subr.bf16.mxu1 %v5077_v29 }
 0x31d   :  { %3650 = vmatpush1.bf16.msra.mxu1 %v5075_v30 }
 0x31e   :  { %3651 = vmatprep.subr.bf16.mxu1 %v5080_v31 }
 0x321   :  { %3652 = vmatpush1.bf16.msra.mxu1 %v5078_v32 }
 0x322   :  { %3653 = vmatprep.subr.bf16.mxu1 %v5083_v33 }
 0x325   :  { %3654 = vmatpush1.bf16.msra.mxu1 %v5081_v34 }
 0x326   :  { %4377 = vmatprep.subr.msk.bf16.mxu1 %vm3368_vm11, %v5084_v35 }
 0x329   :  { %3656 = vmatpush2.bf16.msra.mxu1 %v3634_v38  ;;  %v5111_v38 = vld [vmem:[%s5605_s11 + $0x30] sm:$0xff]  }
 0x32a   :  { %3657 = vmatprep.subr.bf16.mxu1 %v5089_v39  ;;  %v5112_v39 = vld [vmem:[%s5605_s11 + $0x68] sm:$0xff]  }
 0x32d   :  { %3658 = vmatpush2.bf16.msra.mxu1 %v5087_v40  ;;  %v5113_v40 = vld [vmem:[%s5605_s11 + $0x28] sm:$0xff]  }
 0x32e   :  { %3659 = vmatprep.subr.bf16.mxu1 %v5092_v61 }
 0x331   :  { %3660 = vmatpush2.bf16.msra.mxu1 %v5090_v0 }
 0x332   :  { %3661 = vmatprep.subr.bf16.mxu1 %v5095_v1 }
 0x335   :  { %3662 = vmatpush2.bf16.msra.mxu1 %v5093_v2 }
 0x336   :  { %3663 = vmatprep.subr.bf16.mxu1 %v5098_v62 }
 0x339   :  { %3664 = vmatpush2.bf16.msra.mxu1 %v5096_v3 }
 0x33a   :  { %3665 = vmatprep.subr.bf16.mxu1 %v5101_v4 }
 0x33d   :  { %3666 = vmatpush2.bf16.msra.mxu1 %v5099_v5 }
 0x33e   :  { %3667 = vmatprep.subr.bf16.mxu1 %v5104_v6 }
 0x341   :  { %3668 = vmatpush2.bf16.msra.mxu1 %v5102_v7 }
 0x342   :  { %3669 = vmatprep.subr.bf16.mxu1 %v5107_v8 }
 0x345   :  { %3670 = vmatpush2.bf16.msra.mxu1 %v5105_v12 }
 0x388   :  { %v3102_v41 = vpop.f32.mrf.mxu0 }
 0x389   :  { %v3103_v20 = vadd.f32 %v3102_v41, %v2737_v42  ;;  %v5114_v41 = vld [vmem:[%s5605_s11 + $0x60] sm:$0xff]   ;;  %v5119_v42 = vld [vmem:[%s5605_s11 + $0x10] sm:$0xff]  }
 0x38a   :  { %v3104_v21 = vpop.f32.mrf.mxu0 }
 0x38b   :  { %v3105_v47 = vadd.f32 %v3104_v21, %v2741_v53  ;;  %v5115_v21 = vld [vmem:[%s5605_s11 + $0x20] sm:$0xff]   ;;  %v5120_v53 = vld [vmem:[%s5605_s11 + $0x48] sm:$0xff]  }
 0x38c   :  { %v3106_v9 = vpop.f32.mrf.mxu0 }
 0x38d   :  { %v5116_v9 = vld [vmem:[%s5605_s11 + $0x58] sm:$0xff]  }
 0x38e   :  { %v3107_v10 = vpop.f32.mrf.mxu0 }
 0x38f   :  { %v5117_v10 = vld [vmem:[%s5605_s11 + $0x18] sm:$0xff]  }
 0x3c8   :  { %v3143_v46 = vpop.f32.mrf.mxu1 }
 0x3c9   :  { %v3144_v37 = vadd.f32 %v3143_v46, %v3103_v20  ;;  %v5121_v20 = vld [vmem:[%s5605_s11 + $0x8] sm:$0xff]   ;;  %v5122_v46 = vld [vmem:[%s5605_s11 + $0x40] sm:$0xff]  }
 0x3ca   :  { %v3145_v48 = vpop.f32.mrf.mxu1 }
 0x3cb   :  { %v3152_v49 = vmul.f32 1.442695, %v3144_v37  ;;  %v3146_v50 = vadd.f32 %v3145_v48, %v3105_v47  ;;  %vm3150_vm12 = vcmp.gt.f32.partialorder %v3144_v37, 0.0  ;;  %v5123_v47 = vld [vmem:[%s5605_s11] sm:$0xff]  }
 0x3cc   :  { %v3147_v51 = vpop.f32.mrf.mxu1 }
 0x3cd   :  { %5140 = vpow2.f32 %v3152_v49  ;;  %v3154_v52 = vmul.f32 1.442695, %v3146_v50  ;;  %vm3151_vm13 = vcmp.gt.f32.partialorder %v3146_v50, 0.0 }
 0x3ce   :  { %v3148_v54 = vpop.f32.mrf.mxu1 }
 0x3cf   :  { %5142 = vpow2.f32 %v3154_v52 }
 0x3da   :  { %v5141_v55 = vpop.eup %5140 }
 0x3db   :  { %v4307_v56 = vadd.f32 -1.0, %v5141_v55 }
 0x3dc   :  { %v5143_v57 = vpop.eup %5142 }
 0x3dd   :  { %v4308_v58 = vadd.f32 -1.0, %v5143_v57  ;;  %v3158_v44 = vsel %vm3150_vm12, %v3144_v37, %v4307_v56  ;;  %v3460_v37 = vld [vmem:[%s5604_s10] sm:$0x3]  ;;  %s5294_s10 = smov [#allocation12]  }
 0x3de   :  { %v3160_v63 = vpack.c.bf16 %v3158_v44, %v3158_v44  ;;  %v3465_v48 = vrot.slane %v3460_v37, %v5461_v43  ;;  %v3469_v49 = vrot.slane %v3460_v37, %v5469_v45  ;;  %s3888_s11 = sshll.u32 %s5294_s10, 4  ;;  %s3889_s11 = int_to_ptr.vmem [resolvable:$true] %s3888_s11 }
 0x3df   :  { %v3159_v59 = vsel %vm3151_vm13, %v3146_v50, %v4308_v58  ;;  %s5256_s23 = scalar_lea.vmem %s3889_s11, 256  ;;  %p5261_p12 = scmp.lt.s32.totalorder %s3889_s11, %s3889_s11 }
 0x3e0   :  { %v3161_v60 = vpack.c.bf16 %v3159_v59, %v3159_v59  ;;  %p5257_p11 = scmp.ne.s32.totalorder %s3889_s11, %s5256_s23  ;;  %p5262_p13 = scmp.lt.s32.totalorder %s5256_s23, %s5256_s23 }
 0x3e2   :  { %4342 = vmatprep.mubr.msk.bf16.mxu0 %vm3364_vm14, %v3161_v60  ;;  %p5263_p0 = por %p5262_p13, %p5261_p12 }
 0x3e3   :  { %3408 = vmatmul.mubr.bf16.vlgmr.msra.gmra.mxu0 %v3160_v63 }
 0x3e4   :  { %4400 = vmatpush3.bf16.msra.mxu0 %v5109_v14  ;;  %p5264_p1 = pnand %p5263_p0, %p5257_p11 }
 0x3e5   :  { %4401 = vmatprep.subr.bf16.mxu0 %v5110_v15 }
 0x3e8   :  { %4402 = vmatpush3.bf16.msra.mxu0 %v5111_v38 }
 0x3e9   :  { %4403 = vmatprep.subr.bf16.mxu0 %v5112_v39 }
 0x3ec   :  { %4404 = vmatpush3.bf16.msra.mxu0 %v5113_v40 }
 0x3ed   :  { %4405 = vmatprep.subr.bf16.mxu0 %v5114_v41 }
 0x3f0   :  { %4406 = vmatpush3.bf16.msra.mxu0 %v5115_v21 }
 0x3f1   :  { %4407 = vmatprep.subr.bf16.mxu0 %v5116_v9 }
 0x3f4   :  { %4408 = vmatpush3.bf16.msra.mxu0 %v5117_v10 }
 0x3f5   :  { %4409 = vmatprep.subr.bf16.mxu0 %v5118_v17 }
 0x3f8   :  { %4410 = vmatpush3.bf16.msra.mxu0 %v5119_v42 }
 0x3f9   :  { %4411 = vmatprep.subr.bf16.mxu0 %v5120_v53 }
 0x3fc   :  { %4412 = vmatpush3.bf16.msra.mxu0 %v5121_v20 }
 0x3fd   :  { %4413 = vmatprep.subr.bf16.mxu0 %v5122_v46 }
 0x400   :  { %4414 = vmatpush3.bf16.msra.mxu0 %v5123_v47 }
 0x4a3   :  { %v3409_v22 = vpop.f32.mrf.mxu0 }
 0x4a4   :  { %v3410_v23 = vadd.f32 %v3409_v22, %v3199_v18 }
 0x4a5   :  { %v3411_v11 = vpop.f32.mrf.mxu0 }
 0x4a6   :  { %v3418_v24 = vmul.f32 1.442695, %v3410_v23  ;;  %v3412_v25 = vadd.f32 %v3411_v11, %v3203_v19  ;;  %vm3416_vm15 = vcmp.gt.f32.partialorder %v3410_v23, 0.0 }
 0x4a7   :  { %v3413_v26 = vpop.f32.mrf.mxu0 }
 0x4a8   :  { %5144 = vpow2.f32 %v3418_v24  ;;  %v3420_v27 = vmul.f32 1.442695, %v3412_v25  ;;  %vm3417_vm0 = vcmp.gt.f32.partialorder %v3412_v25, 0.0 }
 0x4a9   :  { %v3414_v28 = vpop.f32.mrf.mxu0 }
 0x4aa   :  { %5146 = vpow2.f32 %v3420_v27 }
 0x4b5   :  { %v5145_v29 = vpop.eup %5144 }
 0x4b6   :  { %v4343_v30 = vadd.f32 -1.0, %v5145_v29 }
 0x4b7   :  { %v5147_v31 = vpop.eup %5146 }
 0x4b8   :  { %v4344_v32 = vadd.f32 -1.0, %v5147_v31  ;;  %v3424_v33 = vsel %vm3416_vm15, %v3410_v23, %v4343_v30 }
 0x4b9   :  { %v3426_v36 = vpack.c.bf16 %v3424_v33, %v3424_v33 }
 0x4ba   :  { %v3425_v34 = vsel %vm3417_vm0, %v3412_v25, %v4344_v32 }
 0x4bb   :  { %v3427_v35 = vpack.c.bf16 %v3425_v34, %v3425_v34 }
 0x4bd   :  { %4378 = vmatprep.mubr.msk.bf16.mxu1 %vm3364_vm14, %v3427_v35 }
 0x4be   :  { %3672 = vmatmul.mubr.bf16.vlgmr.msra.gmra.mxu1 %v3426_v36 }
 0x57e   :  { %v3673_v50 = vpop.f32.mrf.mxu1 }
 0x57f   :  { %v3674_v51 = vadd.f32 %v3673_v50, %v3465_v48 }
 0x580   :  { %v3675_v52 = vpop.f32.mrf.mxu1 }
 0x581   :  { %v3682_v54 = vmul.f32 1.442695, %v3674_v51  ;;  %v3676_v55 = vadd.f32 %v3675_v52, %v3469_v49  ;;  %vm3680_vm1 = vcmp.gt.f32.partialorder %v3674_v51, 0.0 }
 0x582   :  { %v3677_v56 = vpop.f32.mrf.mxu1 }
 0x583   :  { %5148 = vpow2.f32 %v3682_v54  ;;  %v3684_v57 = vmul.f32 1.442695, %v3676_v55  ;;  %vm3681_vm2 = vcmp.gt.f32.partialorder %v3676_v55, 0.0 }
 0x584   :  { %v3678_v58 = vpop.f32.mrf.mxu1 }
 0x585   :  { %5150 = vpow2.f32 %v3684_v57 }
 0x590   :  { %v5149_v44 = vpop.eup %5148 }
 0x591   :  { %v4379_v59 = vadd.f32 -1.0, %v5149_v44 }
 0x592   :  { %v5151_v60 = vpop.eup %5150 }
 0x593   :  { %v3688_v63 = vsel %vm3680_vm1, %v3674_v51, %v4379_v59  ;;  %v4380_v61 = vadd.f32 -1.0, %v5151_v60 }
 0x594   :  { %3690 = vst [vmem:[#allocation12] sm:$0xff] %v3688_v63  ;;  %v3692_v0 = vpack.c.bf16 %v3688_v63, %v3688_v63 }
 0x595   :  { %v3689_v43 = vsel %vm3681_vm2, %v3676_v55, %v4380_v61 }
 0x596   :  { %v3693_v45 = vpack.c.bf16 %v3689_v43, %v3689_v43  ;;  %3691 = vst.msk [vmem:[#allocation12 + $0x8] sm:$0xff] %vm3364_vm14, %v3689_v43 }
 0x598   :  { %4398 = vmatprep.mubr.msk.bf16.mxu0 %vm3364_vm14, %v3693_v45 }
 0x599   :  { %3867 = vmatmul.mubr.bf16.vlgmr.msra.gmra.mxu0 %v3692_v0 }
 0x59a   :  { %5267 = shalt.err (!%p5264_p1)
}
 0x59b   :  { %3891 = dma.vmem_to_hbm [thread:$0]  %s3889_s11, 256, %s5607_s13, [#allocation5]   ;;  %v4381_v2 = vld [vmem:[#allocation2] ss:$0 sm:$0xff]  ;;  %vm3880_vm3 = vcmask 7168  }
 0x659   :  { %v4415_v1 = vpop.f32.mrf.mxu0 }
 0x65b   :  { %v4416_v62 = vpop.f32.mrf.mxu0 }
 0x65c   :  { %v4417_v3 = vadd.f32 %v4416_v62, %v4415_v1 }
 0x65d   :  { %v4418_v4 = vpop.f32.mrf.mxu0 }
 0x65e   :  { %v3869_v5 = vadd.f32 %v4417_v3, %v4381_v2 }
 0x65f   :  { %v4419_v6 = vpop.f32.mrf.mxu0 }
 0x660   :  { %v3874_v7 = vsub.f32 0.0, %v3869_v5 }
 0x662   :  { %v3875_v8 = vmul.f32 1.442695, %v3874_v7 }
 0x664   :  { %5152 = vpow2.f32 %v3875_v8 }
 0x671   :  { %v5153_v12 = vpop.eup %5152 }
 0x672   :  { %v3877_v13 = vadd.f32 1.0, %v5153_v12 }
 0x674   :  { %5154 = vrcp.f32 %v3877_v13 }
 0x681   :  { %v5155_v14 = vpop.eup %5154 }
 0x682   :  { %3881 = vst.msk [vmem:[%s5608_s14] sm:$0xff] %vm3880_vm3, %v5155_v14 }
 0x683   :  { %5282 = dma.done.wait [#allocation5], 256  }
 0x684   :  { %5283 = vsyncadd [#allocation5], 4294967040 }
 0x685   :  { %3899 = vsyncpa [#allocation4], 1 }
 0x686   :  { %3900 = vsyncpa [#allocation7], 1 }
 0x687   :  { %3901 = vsyncpa [#allocation10], 1 }
 0x688   :  { %3902 = vsyncpa [#allocation5], 1 }

</bundles_post_ra>
